<compile_context>
chip_gen: v6e
topology: v6e:2x2x1
jax: 0.10.0
libtpu: 0.0.40
codegen_flags: <defaults>
</compile_context>

<pallas_src>
import functools

import jax
import jax.numpy as jnp
import numpy as np
from jax import lax
from jax.experimental import pallas as pl
from jax.experimental.pallas import tpu as pltpu

BN_EPS = 1e-5


def _basic_block_kernel(x_ref, w1_ref, w2_ref, g1_ref, b1_ref, g2_ref, b2_ref,
                        out_ref, xcm_ref, *, height, width):
    # x_ref   : (N, C, H*W)   input, contiguous NCHW view (no wrapper transpose)
    # w*_ref  : (9, Cout, Cin) conv weights, one MXU-ready slab per 3x3 tap
    # g*,b*   : (C, 1)        BN affine params (per-channel on sublanes)
    # out_ref : (N, C, H*W)   output, contiguous NCHW view
    # xcm_ref : (C, N*H*W)    VMEM scratch for the channel-major gather
    n_batch, C, hw = x_ref.shape
    P = n_batch * hw
    inv_p = 1.0 / P

    # ---- gather NCHW input into channel-major, lane-dense (C, N*H*W) --------
    # (128-aligned lane slices; in-kernel layout change instead of a wrapper
    #  transpose that would round-trip the activations through HBM)
    for n in range(n_batch):
        xcm_ref[:, n * hw:(n + 1) * hw] = x_ref[n]
    x = xcm_ref[...]                               # (C, P); also the residual

    # ---- per-position (h, w) indices for zero-padding boundary masks --------
    pos = lax.broadcasted_iota(jnp.int32, (1, P), 1)
    if (width & (width - 1)) == 0 and (height & (height - 1)) == 0:
        log2_w = width.bit_length() - 1            # cheap VPU shift/and path
        w_idx = pos & (width - 1)
        h_idx = (pos >> log2_w) & (height - 1)
    else:
        w_idx = pos % width
        h_idx = (pos // width) % height

    def conv3x3(v, w_ref):
        # 3x3 / pad=1 / stride=1 conv as 9 accumulated (Cout,Cin)@(Cin,P) MXU
        # dots.  Taps are fetched by XLU lane rotation of v; zero padding (and
        # cross-image wrap-around of the roll) is handled by per-tap boundary
        # masks built on the fly (never materialized in VMEM, never hoisted).
        acc = None
        for ky in range(3):
            for kx in range(3):
                t = ky * 3 + kx
                dy, dx = ky - 1, kx - 1
                d = dy * width + dx
                if d == 0:
                    tap = v                                     # center tap
                else:
                    # tap[:, p] = v[:, (p + d) % P]   (XLU lane rotation)
                    tap = pltpu.roll(v, (-d) % P, axis=1)
                    cond = None
                    if dy == -1:
                        cond = h_idx >= 1
                    elif dy == 1:
                        cond = h_idx < height - 1
                    if dx == -1:
                        c = w_idx >= 1
                        cond = c if cond is None else cond & c
                    elif dx == 1:
                        c = w_idx < width - 1
                        cond = c if cond is None else cond & c
                    tap = tap * cond.astype(jnp.float32)
                prod = jnp.dot(w_ref[t], tap,
                               preferred_element_type=jnp.float32)   # (C, P)
                acc = prod if acc is None else acc + prod
        return acc

    def batchnorm(y, g_ref, b_ref, relu):
        # Training-mode BN over the (N*H*W) lane axis, biased variance,
        # centered two-pass statistics for numerical robustness.
        mean = jnp.sum(y, axis=1, keepdims=True) * inv_p              # (C, 1)
        yc = y - mean
        var = jnp.sum(yc * yc, axis=1, keepdims=True) * inv_p
        out = yc * (g_ref[...] * lax.rsqrt(var + BN_EPS)) + b_ref[...]
        return jnp.maximum(out, 0.0) if relu else out

    # ---- conv1 + bn1 + relu,  conv2 + bn2 ------------------------------------
    h1 = batchnorm(conv3x3(x, w1_ref), g1_ref, b1_ref, relu=True)
    h2 = batchnorm(conv3x3(h1, w2_ref), g2_ref, b2_ref, relu=False)

    # ---- residual add (downsample is None) + relu -----------------------------
    y = jnp.maximum(h2 + x, 0.0)                                      # (C, P)

    # ---- scatter back to (N, C, H*W): lane-dense, 128-aligned slices ---------
    for n in range(n_batch):
        out_ref[n] = y[:, n * hw:(n + 1) * hw]


@jax.jit
def basic_block_forward(x_nchw, w1, w2, gamma1, beta1, gamma2, beta2):
    """x_nchw: (N, C, H, W) float32.  Weights w*: (3, 3, Cin, Cout) HWIO."""
    N, C, H, W = x_nchw.shape
    if w1.shape != (3, 3, C, C) or w2.shape != (3, 3, C, C):
        # stride=1 / downsample=None requires inplanes == planes.
        raise ValueError("BasicBlock without downsample needs inplanes == planes")
    HW = H * W

    # Free, contiguous reshape only (layout change happens inside the kernel).
    x_in = x_nchw.reshape(N, C, HW)

    # (3,3,Cin,Cout) HWIO -> (9, Cout, Cin): one MXU-ready slab per tap,
    # indexed on the leading axis in-kernel (no mid-lane-tile weight slices).
    w1_t = jnp.transpose(w1.reshape(9, C, C), (0, 2, 1))
    w2_t = jnp.transpose(w2.reshape(9, C, C), (0, 2, 1))

    vmem = pl.BlockSpec(memory_space=pltpu.MemorySpace.VMEM)
    out = pl.pallas_call(
        functools.partial(_basic_block_kernel, height=H, width=W),
        out_shape=jax.ShapeDtypeStruct((N, C, HW), jnp.float32),
        in_specs=[vmem] * 7,
        out_specs=vmem,
        scratch_shapes=[pltpu.VMEM((C, N * HW), jnp.float32)],
    )(x_in, w1_t, w2_t,
      gamma1.reshape(C, 1), beta1.reshape(C, 1),
      gamma2.reshape(C, 1), beta2.reshape(C, 1))

    return out.reshape(N, C, H, W)


def _reference(x_nchw, w1, w2, gamma1, beta1, gamma2, beta2):
    """Pure-JAX reference (same math, NCHW) for validation."""
    def conv3x3(x, w_hwio):
        w_oihw = jnp.transpose(w_hwio, (3, 2, 0, 1))
        return lax.conv_general_dilated(
            x, w_oihw, window_strides=(1, 1), padding=((1, 1), (1, 1)),
            dimension_numbers=("NCHW", "OIHW", "NCHW"))

    def bn(x, g, b):
        mean = jnp.mean(x, axis=(0, 2, 3), keepdims=True)
        var = jnp.mean((x - mean) ** 2, axis=(0, 2, 3), keepdims=True)
        return ((x - mean) * lax.rsqrt(var + BN_EPS) * g.reshape(1, -1, 1, 1)
                + b.reshape(1, -1, 1, 1))

    out = jnp.maximum(bn(conv3x3(x_nchw, w1), gamma1, beta1), 0.0)
    out = bn(conv3x3(out, w2), gamma2, beta2)
    return jnp.maximum(out + x_nchw, 0.0)


def _make_params(key, inplanes, planes, coeff=3.0):
    k1, k2 = jax.random.split(key)
    # Conv2d kaiming-uniform-ish deterministic init; HWIO layout.
    fan_in1 = inplanes * 9
    fan_in2 = planes * 9
    w1 = jax.random.uniform(k1, (3, 3, inplanes, planes), jnp.float32,
                            -1.0, 1.0) / np.sqrt(fan_in1)
    w2 = jax.random.uniform(k2, (3, 3, planes, planes), jnp.float32,
                            -1.0, 1.0) / np.sqrt(fan_in2)

    # Approximate spectral_norm_conv reparameterization: clamp Lipschitz to
    # `coeff` using a Frobenius-norm proxy for sigma (weight preprocessing).
    def spectral_scale(w):
        sigma_proxy = jnp.sqrt(jnp.sum(w * w))
        factor = jnp.maximum(sigma_proxy / coeff, 1.0)
        return w / factor

    w1 = spectral_scale(w1)
    w2 = spectral_scale(w2)

    # BN affine params (PyTorch defaults: gamma=1, beta=0).  SpectralBatchNorm
    # clamps gamma by max(|gamma|/sqrt(running_var+eps))/coeff; with fresh
    # running_var=1 and gamma=1 the clamp factor is 1 (no-op), folded here.
    gamma1 = jnp.ones((planes,), jnp.float32)
    beta1 = jnp.zeros((planes,), jnp.float32)
    gamma2 = jnp.ones((planes,), jnp.float32)
    beta2 = jnp.zeros((planes,), jnp.float32)
    lip = jnp.max(jnp.abs(gamma1) * lax.rsqrt(jnp.ones_like(gamma1) + BN_EPS))
    factor = jnp.maximum(lip / coeff, 1.0)
    gamma1 = gamma1 / factor
    gamma2 = gamma2 / factor
    return w1, w2, gamma1, beta1, gamma2, beta2


if __name__ == "__main__":
    key = jax.random.PRNGKey(0)
    kx, kp = jax.random.split(key)

    # BasicBlock(inplanes=16, planes=16, stride=1, downsample=None)
    N, C, H, W = 2, 16, 16, 16
    x = jax.random.normal(kx, (N, C, H, W), jnp.float32)
    params = _make_params(kp, inplanes=C, planes=C, coeff=3.0)

    out = basic_block_forward(x, *params)
    out = jax.block_until_ready(out)

    ref = _reference(x, *params)
    np.testing.assert_allclose(np.asarray(out), np.asarray(ref),
                               rtol=2e-4, atol=2e-4)
    assert out.shape == (N, C, H, W)
    print("KERNEL_OK")
</pallas_src>

<mosaic_0001>
module attributes {stable_mosaic.version = 11 : i64} {
  func.func @_basic_block_kernel(%arg0: memref<2x16x256xf32, #tpu.memory_space<vmem>>, %arg1: memref<9x16x16xf32, #tpu.memory_space<vmem>>, %arg2: memref<9x16x16xf32, #tpu.memory_space<vmem>>, %arg3: memref<16x1xf32, #tpu.memory_space<vmem>>, %arg4: memref<16x1xf32, #tpu.memory_space<vmem>>, %arg5: memref<16x1xf32, #tpu.memory_space<vmem>>, %arg6: memref<16x1xf32, #tpu.memory_space<vmem>>, %arg7: memref<2x16x256xf32, #tpu.memory_space<vmem>>, %arg8: memref<16x512xf32, #tpu.memory_space<vmem>>) attributes {dimension_semantics = [], scalar_prefetch = 0 : i64, scratch_operands = 1 : i64, tpu.core_type = #tpu.core_type<tc>} {
    %c0 = arith.constant 0 : index
    %c0_0 = arith.constant 0 : index
    %c0_1 = arith.constant 0 : index
    %0 = vector.load %arg0[%c0, %c0_0, %c0_1] : memref<2x16x256xf32, #tpu.memory_space<vmem>>, vector<1x16x256xf32>
    %1 = vector.shape_cast %0 : vector<1x16x256xf32> to vector<16x256xf32>
    %c0_2 = arith.constant 0 : index
    %c0_3 = arith.constant 0 : index
    %2 = vector.load %arg8[%c0_2, %c0_3] : memref<16x512xf32, #tpu.memory_space<vmem>>, vector<16x256xf32>
    tpu.vector_store %arg8[%c0_2, %c0_3], %1 {strides = array<i32>} : memref<16x512xf32, #tpu.memory_space<vmem>>, vector<16x256xf32>,
    %c1 = arith.constant 1 : index
    %c0_4 = arith.constant 0 : index
    %c0_5 = arith.constant 0 : index
    %3 = vector.load %arg0[%c1, %c0_4, %c0_5] : memref<2x16x256xf32, #tpu.memory_space<vmem>>, vector<1x16x256xf32>
    %4 = vector.shape_cast %3 : vector<1x16x256xf32> to vector<16x256xf32>
    %c0_6 = arith.constant 0 : index
    %c256 = arith.constant 256 : index
    %5 = vector.load %arg8[%c0_6, %c256] : memref<16x512xf32, #tpu.memory_space<vmem>>, vector<16x256xf32>
    tpu.vector_store %arg8[%c0_6, %c256], %4 {strides = array<i32>} : memref<16x512xf32, #tpu.memory_space<vmem>>, vector<16x256xf32>,
    %c0_7 = arith.constant 0 : index
    %c0_8 = arith.constant 0 : index
    %6 = vector.load %arg8[%c0_7, %c0_8] : memref<16x512xf32, #tpu.memory_space<vmem>>, vector<16x512xf32>
    %7 = tpu.iota {dimensions = array<i32: 1>} : vector<1x512xi32>
    %c15_i32 = arith.constant 15 : i32
    %8 = vector.broadcast %c15_i32 : i32 to vector<1x512xi32>
    %9 = arith.andi %7, %8 : vector<1x512xi32>
    %c4_i32 = arith.constant 4 : i32
    %10 = vector.broadcast %c4_i32 : i32 to vector<1x512xi32>
    %11 = arith.shrsi %7, %10 : vector<1x512xi32>
    %c15_i32_9 = arith.constant 15 : i32
    %12 = vector.broadcast %c15_i32_9 : i32 to vector<1x512xi32>
    %13 = arith.andi %11, %12 : vector<1x512xi32>
    %c17_i32 = arith.constant 17 : i32
    %14 = tpu.dynamic_rotate %6 by %c17_i32 dim 1 : vector<16x512xf32>, i32 -> vector<16x512xf32>
    %c1_i32 = arith.constant 1 : i32
    %15 = vector.broadcast %c1_i32 : i32 to vector<1x512xi32>
    %16 = arith.cmpi sge, %13, %15 : vector<1x512xi32>
    %c1_i32_10 = arith.constant 1 : i32
    %17 = vector.broadcast %c1_i32_10 : i32 to vector<1x512xi32>
    %18 = arith.cmpi sge, %9, %17 : vector<1x512xi32>
    %19 = arith.andi %16, %18 : vector<1x512xi1>
    %20 = arith.extui %19 : vector<1x512xi1> to vector<1x512xi32>
    %21 = arith.sitofp %20 : vector<1x512xi32> to vector<1x512xf32>
    %22 = vector.broadcast %21 : vector<1x512xf32> to vector<16x512xf32>
    %23 = arith.mulf %14, %22 : vector<16x512xf32>
    %c0_11 = arith.constant 0 : index
    %c0_12 = arith.constant 0 : index
    %c0_13 = arith.constant 0 : index
    %24 = vector.load %arg1[%c0_11, %c0_12, %c0_13] : memref<9x16x16xf32, #tpu.memory_space<vmem>>, vector<1x16x16xf32>
    %25 = vector.shape_cast %24 : vector<1x16x16xf32> to vector<16x16xf32>
    %cst = arith.constant dense<0.000000e+00> : vector<16x512xf32>
    %26 = tpu.matmul %25, %23, %cst {dimension_numbers = #tpu.dot_dimension_numbers<[1], [0], [0], [1], [0, 0, 1, 1], [], []>} : vector<16x16xf32>, vector<16x512xf32>, vector<16x512xf32> -> vector<16x512xf32>
    %c16_i32 = arith.constant 16 : i32
    %27 = tpu.dynamic_rotate %6 by %c16_i32 dim 1 : vector<16x512xf32>, i32 -> vector<16x512xf32>
    %c1_i32_14 = arith.constant 1 : i32
    %28 = vector.broadcast %c1_i32_14 : i32 to vector<1x512xi32>
    %29 = arith.cmpi sge, %13, %28 : vector<1x512xi32>
    %30 = arith.extui %29 : vector<1x512xi1> to vector<1x512xi32>
    %31 = arith.sitofp %30 : vector<1x512xi32> to vector<1x512xf32>
    %32 = vector.broadcast %31 : vector<1x512xf32> to vector<16x512xf32>
    %33 = arith.mulf %27, %32 : vector<16x512xf32>
    %c1_15 = arith.constant 1 : index
    %c0_16 = arith.constant 0 : index
    %c0_17 = arith.constant 0 : index
    %34 = vector.load %arg1[%c1_15, %c0_16, %c0_17] : memref<9x16x16xf32, #tpu.memory_space<vmem>>, vector<1x16x16xf32>
    %35 = vector.shape_cast %34 : vector<1x16x16xf32> to vector<16x16xf32>
    %cst_18 = arith.constant dense<0.000000e+00> : vector<16x512xf32>
    %36 = tpu.matmul %35, %33, %cst_18 {dimension_numbers = #tpu.dot_dimension_numbers<[1], [0], [0], [1], [0, 0, 1, 1], [], []>} : vector<16x16xf32>, vector<16x512xf32>, vector<16x512xf32> -> vector<16x512xf32>
    %37 = arith.addf %26, %36 : vector<16x512xf32>
    %c15_i32_19 = arith.constant 15 : i32
    %38 = tpu.dynamic_rotate %6 by %c15_i32_19 dim 1 : vector<16x512xf32>, i32 -> vector<16x512xf32>
    %c1_i32_20 = arith.constant 1 : i32
    %39 = vector.broadcast %c1_i32_20 : i32 to vector<1x512xi32>
    %40 = arith.cmpi sge, %13, %39 : vector<1x512xi32>
    %c15_i32_21 = arith.constant 15 : i32
    %41 = vector.broadcast %c15_i32_21 : i32 to vector<1x512xi32>
    %42 = arith.cmpi slt, %9, %41 : vector<1x512xi32>
    %43 = arith.andi %40, %42 : vector<1x512xi1>
    %44 = arith.extui %43 : vector<1x512xi1> to vector<1x512xi32>
    %45 = arith.sitofp %44 : vector<1x512xi32> to vector<1x512xf32>
    %46 = vector.broadcast %45 : vector<1x512xf32> to vector<16x512xf32>
    %47 = arith.mulf %38, %46 : vector<16x512xf32>
    %c2 = arith.constant 2 : index
    %c0_22 = arith.constant 0 : index
    %c0_23 = arith.constant 0 : index
    %48 = vector.load %arg1[%c2, %c0_22, %c0_23] : memref<9x16x16xf32, #tpu.memory_space<vmem>>, vector<1x16x16xf32>
    %49 = vector.shape_cast %48 : vector<1x16x16xf32> to vector<16x16xf32>
    %cst_24 = arith.constant dense<0.000000e+00> : vector<16x512xf32>
    %50 = tpu.matmul %49, %47, %cst_24 {dimension_numbers = #tpu.dot_dimension_numbers<[1], [0], [0], [1], [0, 0, 1, 1], [], []>} : vector<16x16xf32>, vector<16x512xf32>, vector<16x512xf32> -> vector<16x512xf32>
    %51 = arith.addf %37, %50 : vector<16x512xf32>
    %c1_i32_25 = arith.constant 1 : i32
    %52 = tpu.dynamic_rotate %6 by %c1_i32_25 dim 1 : vector<16x512xf32>, i32 -> vector<16x512xf32>
    %c1_i32_26 = arith.constant 1 : i32
    %53 = vector.broadcast %c1_i32_26 : i32 to vector<1x512xi32>
    %54 = arith.cmpi sge, %9, %53 : vector<1x512xi32>
    %55 = arith.extui %54 : vector<1x512xi1> to vector<1x512xi32>
    %56 = arith.sitofp %55 : vector<1x512xi32> to vector<1x512xf32>
    %57 = vector.broadcast %56 : vector<1x512xf32> to vector<16x512xf32>
    %58 = arith.mulf %52, %57 : vector<16x512xf32>
    %c3 = arith.constant 3 : index
    %c0_27 = arith.constant 0 : index
    %c0_28 = arith.constant 0 : index
    %59 = vector.load %arg1[%c3, %c0_27, %c0_28] : memref<9x16x16xf32, #tpu.memory_space<vmem>>, vector<1x16x16xf32>
    %60 = vector.shape_cast %59 : vector<1x16x16xf32> to vector<16x16xf32>
    %cst_29 = arith.constant dense<0.000000e+00> : vector<16x512xf32>
    %61 = tpu.matmul %60, %58, %cst_29 {dimension_numbers = #tpu.dot_dimension_numbers<[1], [0], [0], [1], [0, 0, 1, 1], [], []>} : vector<16x16xf32>, vector<16x512xf32>, vector<16x512xf32> -> vector<16x512xf32>
    %62 = arith.addf %51, %61 : vector<16x512xf32>
    %c4 = arith.constant 4 : index
    %c0_30 = arith.constant 0 : index
    %c0_31 = arith.constant 0 : index
    %63 = vector.load %arg1[%c4, %c0_30, %c0_31] : memref<9x16x16xf32, #tpu.memory_space<vmem>>, vector<1x16x16xf32>
    %64 = vector.shape_cast %63 : vector<1x16x16xf32> to vector<16x16xf32>
    %cst_32 = arith.constant dense<0.000000e+00> : vector<16x512xf32>
    %65 = tpu.matmul %64, %6, %cst_32 {dimension_numbers = #tpu.dot_dimension_numbers<[1], [0], [0], [1], [0, 0, 1, 1], [], []>} : vector<16x16xf32>, vector<16x512xf32>, vector<16x512xf32> -> vector<16x512xf32>
    %66 = arith.addf %62, %65 : vector<16x512xf32>
    %c511_i32 = arith.constant 511 : i32
    %67 = tpu.dynamic_rotate %6 by %c511_i32 dim 1 : vector<16x512xf32>, i32 -> vector<16x512xf32>
    %c15_i32_33 = arith.constant 15 : i32
    %68 = vector.broadcast %c15_i32_33 : i32 to vector<1x512xi32>
    %69 = arith.cmpi slt, %9, %68 : vector<1x512xi32>
    %70 = arith.extui %69 : vector<1x512xi1> to vector<1x512xi32>
    %71 = arith.sitofp %70 : vector<1x512xi32> to vector<1x512xf32>
    %72 = vector.broadcast %71 : vector<1x512xf32> to vector<16x512xf32>
    %73 = arith.mulf %67, %72 : vector<16x512xf32>
    %c5 = arith.constant 5 : index
    %c0_34 = arith.constant 0 : index
    %c0_35 = arith.constant 0 : index
    %74 = vector.load %arg1[%c5, %c0_34, %c0_35] : memref<9x16x16xf32, #tpu.memory_space<vmem>>, vector<1x16x16xf32>
    %75 = vector.shape_cast %74 : vector<1x16x16xf32> to vector<16x16xf32>
    %cst_36 = arith.constant dense<0.000000e+00> : vector<16x512xf32>
    %76 = tpu.matmul %75, %73, %cst_36 {dimension_numbers = #tpu.dot_dimension_numbers<[1], [0], [0], [1], [0, 0, 1, 1], [], []>} : vector<16x16xf32>, vector<16x512xf32>, vector<16x512xf32> -> vector<16x512xf32>
    %77 = arith.addf %66, %76 : vector<16x512xf32>
    %c497_i32 = arith.constant 497 : i32
    %78 = tpu.dynamic_rotate %6 by %c497_i32 dim 1 : vector<16x512xf32>, i32 -> vector<16x512xf32>
    %c15_i32_37 = arith.constant 15 : i32
    %79 = vector.broadcast %c15_i32_37 : i32 to vector<1x512xi32>
    %80 = arith.cmpi slt, %13, %79 : vector<1x512xi32>
    %c1_i32_38 = arith.constant 1 : i32
    %81 = vector.broadcast %c1_i32_38 : i32 to vector<1x512xi32>
    %82 = arith.cmpi sge, %9, %81 : vector<1x512xi32>
    %83 = arith.andi %80, %82 : vector<1x512xi1>
    %84 = arith.extui %83 : vector<1x512xi1> to vector<1x512xi32>
    %85 = arith.sitofp %84 : vector<1x512xi32> to vector<1x512xf32>
    %86 = vector.broadcast %85 : vector<1x512xf32> to vector<16x512xf32>
    %87 = arith.mulf %78, %86 : vector<16x512xf32>
    %c6 = arith.constant 6 : index
    %c0_39 = arith.constant 0 : index
    %c0_40 = arith.constant 0 : index
    %88 = vector.load %arg1[%c6, %c0_39, %c0_40] : memref<9x16x16xf32, #tpu.memory_space<vmem>>, vector<1x16x16xf32>
    %89 = vector.shape_cast %88 : vector<1x16x16xf32> to vector<16x16xf32>
    %cst_41 = arith.constant dense<0.000000e+00> : vector<16x512xf32>
    %90 = tpu.matmul %89, %87, %cst_41 {dimension_numbers = #tpu.dot_dimension_numbers<[1], [0], [0], [1], [0, 0, 1, 1], [], []>} : vector<16x16xf32>, vector<16x512xf32>, vector<16x512xf32> -> vector<16x512xf32>
    %91 = arith.addf %77, %90 : vector<16x512xf32>
    %c496_i32 = arith.constant 496 : i32
    %92 = tpu.dynamic_rotate %6 by %c496_i32 dim 1 : vector<16x512xf32>, i32 -> vector<16x512xf32>
    %c15_i32_42 = arith.constant 15 : i32
    %93 = vector.broadcast %c15_i32_42 : i32 to vector<1x512xi32>
    %94 = arith.cmpi slt, %13, %93 : vector<1x512xi32>
    %95 = arith.extui %94 : vector<1x512xi1> to vector<1x512xi32>
    %96 = arith.sitofp %95 : vector<1x512xi32> to vector<1x512xf32>
    %97 = vector.broadcast %96 : vector<1x512xf32> to vector<16x512xf32>
    %98 = arith.mulf %92, %97 : vector<16x512xf32>
    %c7 = arith.constant 7 : index
    %c0_43 = arith.constant 0 : index
    %c0_44 = arith.constant 0 : index
    %99 = vector.load %arg1[%c7, %c0_43, %c0_44] : memref<9x16x16xf32, #tpu.memory_space<vmem>>, vector<1x16x16xf32>
    %100 = vector.shape_cast %99 : vector<1x16x16xf32> to vector<16x16xf32>
    %cst_45 = arith.constant dense<0.000000e+00> : vector<16x512xf32>
    %101 = tpu.matmul %100, %98, %cst_45 {dimension_numbers = #tpu.dot_dimension_numbers<[1], [0], [0], [1], [0, 0, 1, 1], [], []>} : vector<16x16xf32>, vector<16x512xf32>, vector<16x512xf32> -> vector<16x512xf32>
    %102 = arith.addf %91, %101 : vector<16x512xf32>
    %c495_i32 = arith.constant 495 : i32
    %103 = tpu.dynamic_rotate %6 by %c495_i32 dim 1 : vector<16x512xf32>, i32 -> vector<16x512xf32>
    %c15_i32_46 = arith.constant 15 : i32
    %104 = vector.broadcast %c15_i32_46 : i32 to vector<1x512xi32>
    %105 = arith.cmpi slt, %13, %104 : vector<1x512xi32>
    %c15_i32_47 = arith.constant 15 : i32
    %106 = vector.broadcast %c15_i32_47 : i32 to vector<1x512xi32>
    %107 = arith.cmpi slt, %9, %106 : vector<1x512xi32>
    %108 = arith.andi %105, %107 : vector<1x512xi1>
    %109 = arith.extui %108 : vector<1x512xi1> to vector<1x512xi32>
    %110 = arith.sitofp %109 : vector<1x512xi32> to vector<1x512xf32>
    %111 = vector.broadcast %110 : vector<1x512xf32> to vector<16x512xf32>
    %112 = arith.mulf %103, %111 : vector<16x512xf32>
    %c8 = arith.constant 8 : index
    %c0_48 = arith.constant 0 : index
    %c0_49 = arith.constant 0 : index
    %113 = vector.load %arg1[%c8, %c0_48, %c0_49] : memref<9x16x16xf32, #tpu.memory_space<vmem>>, vector<1x16x16xf32>
    %114 = vector.shape_cast %113 : vector<1x16x16xf32> to vector<16x16xf32>
    %cst_50 = arith.constant dense<0.000000e+00> : vector<16x512xf32>
    %115 = tpu.matmul %114, %112, %cst_50 {dimension_numbers = #tpu.dot_dimension_numbers<[1], [0], [0], [1], [0, 0, 1, 1], [], []>} : vector<16x16xf32>, vector<16x512xf32>, vector<16x512xf32> -> vector<16x512xf32>
    %116 = arith.addf %102, %115 : vector<16x512xf32>
    %cst_51 = arith.constant dense<0.000000e+00> : vector<16xf32>
    %117 = vector.multi_reduction <add>, %116, %cst_51 [1] : vector<16x512xf32> to vector<16xf32>
    %118 = vector.shape_cast %117 : vector<16xf32> to vector<16x1xf32>
    %cst_52 = arith.constant 0.001953125 : f32
    %119 = vector.broadcast %cst_52 : f32 to vector<16x1xf32>
    %120 = arith.mulf %118, %119 : vector<16x1xf32>
    %121 = vector.broadcast %120 : vector<16x1xf32> to vector<16x512xf32>
    %122 = arith.subf %116, %121 : vector<16x512xf32>
    %123 = arith.mulf %122, %122 : vector<16x512xf32>
    %cst_53 = arith.constant dense<0.000000e+00> : vector<16xf32>
    %124 = vector.multi_reduction <add>, %123, %cst_53 [1] : vector<16x512xf32> to vector<16xf32>
    %125 = vector.shape_cast %124 : vector<16xf32> to vector<16x1xf32>
    %cst_54 = arith.constant 0.001953125 : f32
    %126 = vector.broadcast %cst_54 : f32 to vector<16x1xf32>
    %127 = arith.mulf %125, %126 : vector<16x1xf32>
    %c0_55 = arith.constant 0 : index
    %c0_56 = arith.constant 0 : index
    %128 = vector.load %arg3[%c0_55, %c0_56] : memref<16x1xf32, #tpu.memory_space<vmem>>, vector<16x1xf32>
    %cst_57 = arith.constant 9.99999974E-6 : f32
    %129 = vector.broadcast %cst_57 : f32 to vector<16x1xf32>
    %130 = arith.addf %127, %129 : vector<16x1xf32>
    %131 = math.rsqrt %130 : vector<16x1xf32>
    %132 = arith.mulf %128, %131 : vector<16x1xf32>
    %133 = vector.broadcast %132 : vector<16x1xf32> to vector<16x512xf32>
    %134 = arith.mulf %122, %133 : vector<16x512xf32>
    %c0_58 = arith.constant 0 : index
    %c0_59 = arith.constant 0 : index
    %135 = vector.load %arg4[%c0_58, %c0_59] : memref<16x1xf32, #tpu.memory_space<vmem>>, vector<16x1xf32>
    %136 = vector.broadcast %135 : vector<16x1xf32> to vector<16x512xf32>
    %137 = arith.addf %134, %136 : vector<16x512xf32>
    %cst_60 = arith.constant 0.000000e+00 : f32
    %138 = vector.broadcast %cst_60 : f32 to vector<16x512xf32>
    %139 = arith.maximumf %137, %138 : vector<16x512xf32>
    %c17_i32_61 = arith.constant 17 : i32
    %140 = tpu.dynamic_rotate %139 by %c17_i32_61 dim 1 : vector<16x512xf32>, i32 -> vector<16x512xf32>
    %c1_i32_62 = arith.constant 1 : i32
    %141 = vector.broadcast %c1_i32_62 : i32 to vector<1x512xi32>
    %142 = arith.cmpi sge, %13, %141 : vector<1x512xi32>
    %c1_i32_63 = arith.constant 1 : i32
    %143 = vector.broadcast %c1_i32_63 : i32 to vector<1x512xi32>
    %144 = arith.cmpi sge, %9, %143 : vector<1x512xi32>
    %145 = arith.andi %142, %144 : vector<1x512xi1>
    %146 = arith.extui %145 : vector<1x512xi1> to vector<1x512xi32>
    %147 = arith.sitofp %146 : vector<1x512xi32> to vector<1x512xf32>
    %148 = vector.broadcast %147 : vector<1x512xf32> to vector<16x512xf32>
    %149 = arith.mulf %140, %148 : vector<16x512xf32>
    %c0_64 = arith.constant 0 : index
    %c0_65 = arith.constant 0 : index
    %c0_66 = arith.constant 0 : index
    %150 = vector.load %arg2[%c0_64, %c0_65, %c0_66] : memref<9x16x16xf32, #tpu.memory_space<vmem>>, vector<1x16x16xf32>
    %151 = vector.shape_cast %150 : vector<1x16x16xf32> to vector<16x16xf32>
    %cst_67 = arith.constant dense<0.000000e+00> : vector<16x512xf32>
    %152 = tpu.matmul %151, %149, %cst_67 {dimension_numbers = #tpu.dot_dimension_numbers<[1], [0], [0], [1], [0, 0, 1, 1], [], []>} : vector<16x16xf32>, vector<16x512xf32>, vector<16x512xf32> -> vector<16x512xf32>
    %c16_i32_68 = arith.constant 16 : i32
    %153 = tpu.dynamic_rotate %139 by %c16_i32_68 dim 1 : vector<16x512xf32>, i32 -> vector<16x512xf32>
    %c1_i32_69 = arith.constant 1 : i32
    %154 = vector.broadcast %c1_i32_69 : i32 to vector<1x512xi32>
    %155 = arith.cmpi sge, %13, %154 : vector<1x512xi32>
    %156 = arith.extui %155 : vector<1x512xi1> to vector<1x512xi32>
    %157 = arith.sitofp %156 : vector<1x512xi32> to vector<1x512xf32>
    %158 = vector.broadcast %157 : vector<1x512xf32> to vector<16x512xf32>
    %159 = arith.mulf %153, %158 : vector<16x512xf32>
    %c1_70 = arith.constant 1 : index
    %c0_71 = arith.constant 0 : index
    %c0_72 = arith.constant 0 : index
    %160 = vector.load %arg2[%c1_70, %c0_71, %c0_72] : memref<9x16x16xf32, #tpu.memory_space<vmem>>, vector<1x16x16xf32>
    %161 = vector.shape_cast %160 : vector<1x16x16xf32> to vector<16x16xf32>
    %cst_73 = arith.constant dense<0.000000e+00> : vector<16x512xf32>
    %162 = tpu.matmul %161, %159, %cst_73 {dimension_numbers = #tpu.dot_dimension_numbers<[1], [0], [0], [1], [0, 0, 1, 1], [], []>} : vector<16x16xf32>, vector<16x512xf32>, vector<16x512xf32> -> vector<16x512xf32>
    %163 = arith.addf %152, %162 : vector<16x512xf32>
    %c15_i32_74 = arith.constant 15 : i32
    %164 = tpu.dynamic_rotate %139 by %c15_i32_74 dim 1 : vector<16x512xf32>, i32 -> vector<16x512xf32>
    %c1_i32_75 = arith.constant 1 : i32
    %165 = vector.broadcast %c1_i32_75 : i32 to vector<1x512xi32>
    %166 = arith.cmpi sge, %13, %165 : vector<1x512xi32>
    %c15_i32_76 = arith.constant 15 : i32
    %167 = vector.broadcast %c15_i32_76 : i32 to vector<1x512xi32>
    %168 = arith.cmpi slt, %9, %167 : vector<1x512xi32>
    %169 = arith.andi %166, %168 : vector<1x512xi1>
    %170 = arith.extui %169 : vector<1x512xi1> to vector<1x512xi32>
    %171 = arith.sitofp %170 : vector<1x512xi32> to vector<1x512xf32>
    %172 = vector.broadcast %171 : vector<1x512xf32> to vector<16x512xf32>
    %173 = arith.mulf %164, %172 : vector<16x512xf32>
    %c2_77 = arith.constant 2 : index
    %c0_78 = arith.constant 0 : index
    %c0_79 = arith.constant 0 : index
    %174 = vector.load %arg2[%c2_77, %c0_78, %c0_79] : memref<9x16x16xf32, #tpu.memory_space<vmem>>, vector<1x16x16xf32>
    %175 = vector.shape_cast %174 : vector<1x16x16xf32> to vector<16x16xf32>
    %cst_80 = arith.constant dense<0.000000e+00> : vector<16x512xf32>
    %176 = tpu.matmul %175, %173, %cst_80 {dimension_numbers = #tpu.dot_dimension_numbers<[1], [0], [0], [1], [0, 0, 1, 1], [], []>} : vector<16x16xf32>, vector<16x512xf32>, vector<16x512xf32> -> vector<16x512xf32>
    %177 = arith.addf %163, %176 : vector<16x512xf32>
    %c1_i32_81 = arith.constant 1 : i32
    %178 = tpu.dynamic_rotate %139 by %c1_i32_81 dim 1 : vector<16x512xf32>, i32 -> vector<16x512xf32>
    %c1_i32_82 = arith.constant 1 : i32
    %179 = vector.broadcast %c1_i32_82 : i32 to vector<1x512xi32>
    %180 = arith.cmpi sge, %9, %179 : vector<1x512xi32>
    %181 = arith.extui %180 : vector<1x512xi1> to vector<1x512xi32>
    %182 = arith.sitofp %181 : vector<1x512xi32> to vector<1x512xf32>
    %183 = vector.broadcast %182 : vector<1x512xf32> to vector<16x512xf32>
    %184 = arith.mulf %178, %183 : vector<16x512xf32>
    %c3_83 = arith.constant 3 : index
    %c0_84 = arith.constant 0 : index
    %c0_85 = arith.constant 0 : index
    %185 = vector.load %arg2[%c3_83, %c0_84, %c0_85] : memref<9x16x16xf32, #tpu.memory_space<vmem>>, vector<1x16x16xf32>
    %186 = vector.shape_cast %185 : vector<1x16x16xf32> to vector<16x16xf32>
    %cst_86 = arith.constant dense<0.000000e+00> : vector<16x512xf32>
    %187 = tpu.matmul %186, %184, %cst_86 {dimension_numbers = #tpu.dot_dimension_numbers<[1], [0], [0], [1], [0, 0, 1, 1], [], []>} : vector<16x16xf32>, vector<16x512xf32>, vector<16x512xf32> -> vector<16x512xf32>
    %188 = arith.addf %177, %187 : vector<16x512xf32>
    %c4_87 = arith.constant 4 : index
    %c0_88 = arith.constant 0 : index
    %c0_89 = arith.constant 0 : index
    %189 = vector.load %arg2[%c4_87, %c0_88, %c0_89] : memref<9x16x16xf32, #tpu.memory_space<vmem>>, vector<1x16x16xf32>
    %190 = vector.shape_cast %189 : vector<1x16x16xf32> to vector<16x16xf32>
    %cst_90 = arith.constant dense<0.000000e+00> : vector<16x512xf32>
    %191 = tpu.matmul %190, %139, %cst_90 {dimension_numbers = #tpu.dot_dimension_numbers<[1], [0], [0], [1], [0, 0, 1, 1], [], []>} : vector<16x16xf32>, vector<16x512xf32>, vector<16x512xf32> -> vector<16x512xf32>
    %192 = arith.addf %188, %191 : vector<16x512xf32>
    %c511_i32_91 = arith.constant 511 : i32
    %193 = tpu.dynamic_rotate %139 by %c511_i32_91 dim 1 : vector<16x512xf32>, i32 -> vector<16x512xf32>
    %c15_i32_92 = arith.constant 15 : i32
    %194 = vector.broadcast %c15_i32_92 : i32 to vector<1x512xi32>
    %195 = arith.cmpi slt, %9, %194 : vector<1x512xi32>
    %196 = arith.extui %195 : vector<1x512xi1> to vector<1x512xi32>
    %197 = arith.sitofp %196 : vector<1x512xi32> to vector<1x512xf32>
    %198 = vector.broadcast %197 : vector<1x512xf32> to vector<16x512xf32>
    %199 = arith.mulf %193, %198 : vector<16x512xf32>
    %c5_93 = arith.constant 5 : index
    %c0_94 = arith.constant 0 : index
    %c0_95 = arith.constant 0 : index
    %200 = vector.load %arg2[%c5_93, %c0_94, %c0_95] : memref<9x16x16xf32, #tpu.memory_space<vmem>>, vector<1x16x16xf32>
    %201 = vector.shape_cast %200 : vector<1x16x16xf32> to vector<16x16xf32>
    %cst_96 = arith.constant dense<0.000000e+00> : vector<16x512xf32>
    %202 = tpu.matmul %201, %199, %cst_96 {dimension_numbers = #tpu.dot_dimension_numbers<[1], [0], [0], [1], [0, 0, 1, 1], [], []>} : vector<16x16xf32>, vector<16x512xf32>, vector<16x512xf32> -> vector<16x512xf32>
    %203 = arith.addf %192, %202 : vector<16x512xf32>
    %c497_i32_97 = arith.constant 497 : i32
    %204 = tpu.dynamic_rotate %139 by %c497_i32_97 dim 1 : vector<16x512xf32>, i32 -> vector<16x512xf32>
    %c15_i32_98 = arith.constant 15 : i32
    %205 = vector.broadcast %c15_i32_98 : i32 to vector<1x512xi32>
    %206 = arith.cmpi slt, %13, %205 : vector<1x512xi32>
    %c1_i32_99 = arith.constant 1 : i32
    %207 = vector.broadcast %c1_i32_99 : i32 to vector<1x512xi32>
    %208 = arith.cmpi sge, %9, %207 : vector<1x512xi32>
    %209 = arith.andi %206, %208 : vector<1x512xi1>
    %210 = arith.extui %209 : vector<1x512xi1> to vector<1x512xi32>
    %211 = arith.sitofp %210 : vector<1x512xi32> to vector<1x512xf32>
    %212 = vector.broadcast %211 : vector<1x512xf32> to vector<16x512xf32>
    %213 = arith.mulf %204, %212 : vector<16x512xf32>
    %c6_100 = arith.constant 6 : index
    %c0_101 = arith.constant 0 : index
    %c0_102 = arith.constant 0 : index
    %214 = vector.load %arg2[%c6_100, %c0_101, %c0_102] : memref<9x16x16xf32, #tpu.memory_space<vmem>>, vector<1x16x16xf32>
    %215 = vector.shape_cast %214 : vector<1x16x16xf32> to vector<16x16xf32>
    %cst_103 = arith.constant dense<0.000000e+00> : vector<16x512xf32>
    %216 = tpu.matmul %215, %213, %cst_103 {dimension_numbers = #tpu.dot_dimension_numbers<[1], [0], [0], [1], [0, 0, 1, 1], [], []>} : vector<16x16xf32>, vector<16x512xf32>, vector<16x512xf32> -> vector<16x512xf32>
    %217 = arith.addf %203, %216 : vector<16x512xf32>
    %c496_i32_104 = arith.constant 496 : i32
    %218 = tpu.dynamic_rotate %139 by %c496_i32_104 dim 1 : vector<16x512xf32>, i32 -> vector<16x512xf32>
    %c15_i32_105 = arith.constant 15 : i32
    %219 = vector.broadcast %c15_i32_105 : i32 to vector<1x512xi32>
    %220 = arith.cmpi slt, %13, %219 : vector<1x512xi32>
    %221 = arith.extui %220 : vector<1x512xi1> to vector<1x512xi32>
    %222 = arith.sitofp %221 : vector<1x512xi32> to vector<1x512xf32>
    %223 = vector.broadcast %222 : vector<1x512xf32> to vector<16x512xf32>
    %224 = arith.mulf %218, %223 : vector<16x512xf32>
    %c7_106 = arith.constant 7 : index
    %c0_107 = arith.constant 0 : index
    %c0_108 = arith.constant 0 : index
    %225 = vector.load %arg2[%c7_106, %c0_107, %c0_108] : memref<9x16x16xf32, #tpu.memory_space<vmem>>, vector<1x16x16xf32>
    %226 = vector.shape_cast %225 : vector<1x16x16xf32> to vector<16x16xf32>
    %cst_109 = arith.constant dense<0.000000e+00> : vector<16x512xf32>
    %227 = tpu.matmul %226, %224, %cst_109 {dimension_numbers = #tpu.dot_dimension_numbers<[1], [0], [0], [1], [0, 0, 1, 1], [], []>} : vector<16x16xf32>, vector<16x512xf32>, vector<16x512xf32> -> vector<16x512xf32>
    %228 = arith.addf %217, %227 : vector<16x512xf32>
    %c495_i32_110 = arith.constant 495 : i32
    %229 = tpu.dynamic_rotate %139 by %c495_i32_110 dim 1 : vector<16x512xf32>, i32 -> vector<16x512xf32>
    %c15_i32_111 = arith.constant 15 : i32
    %230 = vector.broadcast %c15_i32_111 : i32 to vector<1x512xi32>
    %231 = arith.cmpi slt, %13, %230 : vector<1x512xi32>
    %c15_i32_112 = arith.constant 15 : i32
    %232 = vector.broadcast %c15_i32_112 : i32 to vector<1x512xi32>
    %233 = arith.cmpi slt, %9, %232 : vector<1x512xi32>
    %234 = arith.andi %231, %233 : vector<1x512xi1>
    %235 = arith.extui %234 : vector<1x512xi1> to vector<1x512xi32>
    %236 = arith.sitofp %235 : vector<1x512xi32> to vector<1x512xf32>
    %237 = vector.broadcast %236 : vector<1x512xf32> to vector<16x512xf32>
    %238 = arith.mulf %229, %237 : vector<16x512xf32>
    %c8_113 = arith.constant 8 : index
    %c0_114 = arith.constant 0 : index
    %c0_115 = arith.constant 0 : index
    %239 = vector.load %arg2[%c8_113, %c0_114, %c0_115] : memref<9x16x16xf32, #tpu.memory_space<vmem>>, vector<1x16x16xf32>
    %240 = vector.shape_cast %239 : vector<1x16x16xf32> to vector<16x16xf32>
    %cst_116 = arith.constant dense<0.000000e+00> : vector<16x512xf32>
    %241 = tpu.matmul %240, %238, %cst_116 {dimension_numbers = #tpu.dot_dimension_numbers<[1], [0], [0], [1], [0, 0, 1, 1], [], []>} : vector<16x16xf32>, vector<16x512xf32>, vector<16x512xf32> -> vector<16x512xf32>
    %242 = arith.addf %228, %241 : vector<16x512xf32>
    %cst_117 = arith.constant dense<0.000000e+00> : vector<16xf32>
    %243 = vector.multi_reduction <add>, %242, %cst_117 [1] : vector<16x512xf32> to vector<16xf32>
    %244 = vector.shape_cast %243 : vector<16xf32> to vector<16x1xf32>
    %cst_118 = arith.constant 0.001953125 : f32
    %245 = vector.broadcast %cst_118 : f32 to vector<16x1xf32>
    %246 = arith.mulf %244, %245 : vector<16x1xf32>
    %247 = vector.broadcast %246 : vector<16x1xf32> to vector<16x512xf32>
    %248 = arith.subf %242, %247 : vector<16x512xf32>
    %249 = arith.mulf %248, %248 : vector<16x512xf32>
    %cst_119 = arith.constant dense<0.000000e+00> : vector<16xf32>
    %250 = vector.multi_reduction <add>, %249, %cst_119 [1] : vector<16x512xf32> to vector<16xf32>
    %251 = vector.shape_cast %250 : vector<16xf32> to vector<16x1xf32>
    %cst_120 = arith.constant 0.001953125 : f32
    %252 = vector.broadcast %cst_120 : f32 to vector<16x1xf32>
    %253 = arith.mulf %251, %252 : vector<16x1xf32>
    %c0_121 = arith.constant 0 : index
    %c0_122 = arith.constant 0 : index
    %254 = vector.load %arg5[%c0_121, %c0_122] : memref<16x1xf32, #tpu.memory_space<vmem>>, vector<16x1xf32>
    %cst_123 = arith.constant 9.99999974E-6 : f32
    %255 = vector.broadcast %cst_123 : f32 to vector<16x1xf32>
    %256 = arith.addf %253, %255 : vector<16x1xf32>
    %257 = math.rsqrt %256 : vector<16x1xf32>
    %258 = arith.mulf %254, %257 : vector<16x1xf32>
    %259 = vector.broadcast %258 : vector<16x1xf32> to vector<16x512xf32>
    %260 = arith.mulf %248, %259 : vector<16x512xf32>
    %c0_124 = arith.constant 0 : index
    %c0_125 = arith.constant 0 : index
    %261 = vector.load %arg6[%c0_124, %c0_125] : memref<16x1xf32, #tpu.memory_space<vmem>>, vector<16x1xf32>
    %262 = vector.broadcast %261 : vector<16x1xf32> to vector<16x512xf32>
    %263 = arith.addf %260, %262 : vector<16x512xf32>
    %264 = arith.addf %263, %6 : vector<16x512xf32>
    %cst_126 = arith.constant 0.000000e+00 : f32
    %265 = vector.broadcast %cst_126 : f32 to vector<16x512xf32>
    %266 = arith.maximumf %264, %265 : vector<16x512xf32>
    %267 = vector.extract_strided_slice %266 {offsets = [0, 0], sizes = [16, 256], strides = [1, 1]} : vector<16x512xf32> to vector<16x256xf32>
    %c0_127 = arith.constant 0 : index
    %c0_128 = arith.constant 0 : index
    %c0_129 = arith.constant 0 : index
    %268 = vector.load %arg7[%c0_127, %c0_128, %c0_129] : memref<2x16x256xf32, #tpu.memory_space<vmem>>, vector<1x16x256xf32>
    %269 = vector.shape_cast %268 : vector<1x16x256xf32> to vector<16x256xf32>
    %270 = vector.shape_cast %267 : vector<16x256xf32> to vector<1x16x256xf32>
    tpu.vector_store %arg7[%c0_127, %c0_128, %c0_129], %270 {strides = array<i32>} : memref<2x16x256xf32, #tpu.memory_space<vmem>>, vector<1x16x256xf32>,
    %271 = vector.extract_strided_slice %266 {offsets = [0, 256], sizes = [16, 256], strides = [1, 1]} : vector<16x512xf32> to vector<16x256xf32>
    %c1_130 = arith.constant 1 : index
    %c0_131 = arith.constant 0 : index
    %c0_132 = arith.constant 0 : index
    %272 = vector.load %arg7[%c1_130, %c0_131, %c0_132] : memref<2x16x256xf32, #tpu.memory_space<vmem>>, vector<1x16x256xf32>
    %273 = vector.shape_cast %272 : vector<1x16x256xf32> to vector<16x256xf32>
    %274 = vector.shape_cast %271 : vector<16x256xf32> to vector<1x16x256xf32>
    tpu.vector_store %arg7[%c1_130, %c0_131, %c0_132], %274 {strides = array<i32>} : memref<2x16x256xf32, #tpu.memory_space<vmem>>, vector<1x16x256xf32>,
    return
  }
}

</mosaic_0001>

<bundles_post_ra>
// kernel: basic_block_forward.1
= control target key start
LH: loop header
LB: loop body
LE: loop exit
PB: predicated region body
PF: predicated region fallthrough
CT: control target
= control target key end

     0   :  { %v5715_v2 = vmov 0.0   ;;  %s4111_s28 = smov 16   ;;  %s4112_s18 = smov 17   ;;  %v51_v9 = vlaneseq  ;;  %vm167_vm11 = vcmask 130048   ;;  %s5703_s0 = inlined_call_operand.vmem [shape: f32[2,16,256], index: 0, kind: input, shape index: {}]   ;;  %s5704_s1 = inlined_call_operand.vmem [shape: f32[9,16,16], index: 1, kind: input, shape index: {}]   ;;  %s5705_s4 = inlined_call_operand.vmem [shape: f32[16,1], index: 4, kind: input, shape index: {}]   ;;  %s5706_s3 = inlined_call_operand.vmem [shape: f32[16,1], index: 3, kind: input, shape index: {}]   ;;  %s5707_s2 = inlined_call_operand.vmem [shape: f32[9,16,16], index: 2, kind: input, shape index: {}]   ;;  %s5708_s5 = inlined_call_operand.vmem [shape: f32[16,1], index: 5, kind: input, shape index: {}]   ;;  %s5709_s6 = inlined_call_operand.vmem [shape: f32[16,1], index: 6, kind: input, shape index: {}]   ;;  %s5710_s7 = inlined_call_operand.vmem [shape: f32[2,16,256], index: 7, kind: output, shape index: {}]  }
   0x1   :  { %v4163_v0 = vld [vmem:[%s5703_s0 + $0x38] sm:$0xff]  ;;  %v4168_v1 = vld [vmem:[%s5703_s0 + $0x10] sm:$0xff]  ;;  %238 = vmatprep.mubr.f32.mxu0 %v5715_v2  ;;  %315 = vmatprep.mubr.f32.mxu1 %v5715_v2  ;;  %v4184_v4 = vld [vmem:[%s5703_s0] sm:$0xff]  ;;  %s4113_s19 = smov 15   ;;  %s4114_s20 = smov 1  }
   0x2   :  { %137 = vrot.lane.b32.xlu1 %v4163_v0, %s4111_s28  ;;  %125 = vrot.lane.b32.xlu0 %v4168_v1, %s4111_s28  ;;  %v4179_v3 = vld [vmem:[%s5703_s0 + $0x18] sm:$0xff]  ;;  %v4193_v5 = vld [vmem:[%s5703_s0 + $0x8] sm:$0xff]  ;;  %v4258_v10 = vand.u32 127, %v51_v9  ;;  %s4115_s21 = smov 127   ;;  %s4116_s22 = smov 113  }
   0x3   :  { %v4198_v6 = vld [vmem:[%s5703_s0 + $0x28] sm:$0xff]  ;;  %v4207_v7 = vld [vmem:[%s5703_s0 + $0x30] sm:$0xff]  ;;  %v4212_v8 = vld [vmem:[%s5703_s0 + $0x20] sm:$0xff]  ;;  %s4117_s23 = smov 112   ;;  %s4118_s24 = smov 111  }
   0x4   :  { %5783 = vst [vmem:[#allocation3_spill] sm:$0xff] %v4258_v10  ;;  %v4261_v11 = vadd.s32 128, %v4258_v10  ;;  %v60_v15 = vshra.s32 %v4258_v10, 4  ;;  %v56_v16 = vand.u32 15, %v4258_v10  ;;  %v4358_v22 = vadd.s32 384, %v4258_v10  ;;  %v3950_v46 = vld [vmem:[%s5704_s1 + $0x10] sm:$0xff] }
   0x5   :  { %v4361_v23 = vadd.s32 256, %v4258_v10  ;;  %vm5711_vm7 = vcmp.lt.s32.totalorder %v4258_v10, 16  ;;  %vm5714_vm13 = vcmp.lt.s32.totalorder %v4258_v10, 17  ;;  %v3951_v56 = vld [vmem:[%s5704_s1 + $0x18] sm:$0xff] }
   0x6   :  { %129 = vrot.lane.b32.xlu0 %v4179_v3, %s4111_s28  ;;  %123 = vrot.lane.b32.xlu1 %v4184_v4, %s4111_s28  ;;  %v61_v12 = vshra.s32 %v4261_v11, 4  ;;  %v57_v13 = vand.u32 15, %v4261_v11  ;;  %v4288_v18 = vand.u32 15, %v60_v15  ;;  %vm4304_vm3 = vcmp.ge.s32.totalorder %v56_v16, 1 }
   0x7   :  { %v63_v26 = vshra.s32 %v4358_v22, 4  ;;  %v62_v27 = vshra.s32 %v4361_v23, 4  ;;  %v59_v57 = vand.u32 15, %v4358_v22  ;;  %v58_v63 = vand.u32 15, %v4361_v23 }
   0x8   :  { %v4273_v14 = vand.u32 15, %v61_v12  ;;  %vm4284_vm1 = vcmp.ge.s32.totalorder %v57_v13, 1  ;;  %vm5712_vm4 = vcmp.lt.s32.totalorder %v4288_v18, 15  ;;  %vm93_vm8 = vcmp.ge.s32.totalorder %v4288_v18, 1 }
   0x9   :  { %vm4313_vm5 = vmand %vm5712_vm4, %vm4304_vm3  ;;  %v4386_v32 = vsel %vm93_vm8, 1.0, %v5715_v2  ;;  %v4388_v33 = vand.u32 15, %v63_v26  ;;  %v4390_v34 = vand.u32 15, %v62_v27  ;;  %vm4466_vm15 = vcmp.ge.s32.totalorder %v59_v57, 1 }
   0xa   :  { %127 = vrot.lane.b32.xlu0 %v4193_v5, %s4111_s28  ;;  %135 = vrot.lane.b32.xlu1 %v4198_v6, %s4111_s28  ;;  %vm5713_vm0 = vcmp.lt.s32.totalorder %v4273_v14, 15  ;;  %vm94_vm6 = vcmp.ge.s32.totalorder %v4273_v14, 1  ;;  %5793 = vst [vmem:[#allocation5_spill] sm:$0xff] %v4386_v32  ;;  %vm101_vm14 = vmand %vm93_vm8, %vm4304_vm3  ;;  %vm4492_vm4 = vcmp.lt.s32.totalorder %v57_v13, 15  ;;  %v121_v13 = vld [vmem:[%s5704_s1] sm:$0xff] }
   0xb   :  { %vm4294_vm2 = vmand %vm5713_vm0, %vm4284_vm1  ;;  %v4379_v28 = vsel %vm94_vm6, 1.0, %v5715_v2  ;;  %vm96_vm9 = vcmp.ge.s32.totalorder %v4388_v33, 1  ;;  %vm95_vm10 = vcmp.ge.s32.totalorder %v4390_v34, 1  ;;  %v4461_v12 = vsel %vm101_vm14, 1.0, %v5715_v2 }
   0xc   :  { %5792 = vst [vmem:[#allocation4_spill] sm:$0xff] %v4379_v28  ;;  %v4415_v44 = vsel %vm96_vm9, 1.0, %v5715_v2  ;;  %v4420_v45 = vsel %vm95_vm10, 1.0, %v5715_v2  ;;  %vm102_vm12 = vmand %vm94_vm6, %vm4284_vm1 }
   0xd   :  { %5794 = vst [vmem:[#allocation6_spill] sm:$0xff] %v4415_v44  ;;  %5795 = vst [vmem:[#allocation7_spill] sm:$0xff] %v4420_v45  ;;  %v4442_v55 = vsel %vm102_vm12, 1.0, %v5715_v2  ;;  %vm4475_vm12 = vcmp.ge.s32.totalorder %v58_v63, 1 }
   0xe   :  { %133 = vrot.lane.b32.xlu0 %v4207_v7, %s4111_s28  ;;  %131 = vrot.lane.b32.xlu1 %v4212_v8, %s4111_s28  ;;  %5796 = vst [vmem:[#allocation8_spill] sm:$0xff] %v4442_v55  ;;  %5797 = vst [vmem:[#allocation9_spill] sm:$0xff] %v4461_v12 }
   0xf   :  { %vm104_vm14 = vmand %vm96_vm9, %vm4466_vm15 }
  0x10   :  { %v4507_v11 = vsel %vm104_vm14, 1.0, %v5715_v2  ;;  %vm518_vm0 = vmand %vm94_vm6, %vm4492_vm4  ;;  %vm504_vm6 = vcmp.lt.s32.totalorder %v4258_v10, 15 }
  0x11   :  { %5805 = vst [vmem:[#allocation11_spill] sm:$0xff] %v4507_v11 }
  0x12   :  { %70 = vrot.lane.b32.xlu0 %v4168_v1, %s4112_s18  ;;  %74 = vrot.lane.b32.xlu1 %v4179_v3, %s4112_s18 }
  0x16   :  { %82 = vrot.lane.b32.xlu0 %v4163_v0, %s4112_s18  ;;  %68 = vrot.lane.b32.xlu1 %v4184_v4, %s4112_s18 }
  0x1a   :  { %72 = vrot.lane.b32.xlu0 %v4193_v5, %s4112_s18  ;;  %80 = vrot.lane.b32.xlu1 %v4198_v6, %s4112_s18 }
  0x1e   :  { %78 = vrot.lane.b32.xlu0 %v4207_v7, %s4112_s18  ;;  %76 = vrot.lane.b32.xlu1 %v4212_v8, %s4112_s18 }
  0x22   :  { %490 = vrot.lane.b32.xlu0 %v4168_v1, %s4113_s19  ;;  %494 = vrot.lane.b32.xlu1 %v4179_v3, %s4113_s19 }
  0x26   :  { %502 = vrot.lane.b32.xlu0 %v4163_v0, %s4113_s19  ;;  %488 = vrot.lane.b32.xlu1 %v4184_v4, %s4113_s19 }
  0x2a   :  { %492 = vrot.lane.b32.xlu0 %v4193_v5, %s4113_s19  ;;  %500 = vrot.lane.b32.xlu1 %v4198_v6, %s4113_s19 }
  0x2e   :  { %498 = vrot.lane.b32.xlu0 %v4207_v7, %s4113_s19  ;;  %496 = vrot.lane.b32.xlu1 %v4212_v8, %s4113_s19 }
  0x32   :  { %710 = vrot.lane.b32.xlu0 %v4168_v1, %s4114_s20  ;;  %714 = vrot.lane.b32.xlu1 %v4179_v3, %s4114_s20 }
  0x36   :  { %722 = vrot.lane.b32.xlu0 %v4163_v0, %s4114_s20  ;;  %708 = vrot.lane.b32.xlu1 %v4184_v4, %s4114_s20 }
  0x3a   :  { %712 = vrot.lane.b32.xlu0 %v4193_v5, %s4114_s20  ;;  %720 = vrot.lane.b32.xlu1 %v4198_v6, %s4114_s20 }
  0x3e   :  { %718 = vrot.lane.b32.xlu0 %v4207_v7, %s4114_s20  ;;  %716 = vrot.lane.b32.xlu1 %v4212_v8, %s4114_s20 }
  0x42   :  { %1097 = vrot.lane.b32.xlu0 %v4179_v3, %s4115_s21  ;;  %1101 = vrot.lane.b32.xlu1 %v4207_v7, %s4115_s21 }
  0x46   :  { %1093 = vrot.lane.b32.xlu0 %v4168_v1, %s4115_s21  ;;  %1095 = vrot.lane.b32.xlu1 %v4193_v5, %s4115_s21 }
  0x4a   :  { %1099 = vrot.lane.b32.xlu0 %v4212_v8, %s4115_s21  ;;  %1091 = vrot.lane.b32.xlu1 %v4184_v4, %s4115_s21 }
  0x4e   :  { %1105 = vrot.lane.b32.xlu0 %v4163_v0, %s4115_s21  ;;  %1103 = vrot.lane.b32.xlu1 %v4198_v6, %s4115_s21 }
  0x52   :  { %1309 = vrot.lane.b32.xlu0 %v4179_v3, %s4116_s22  ;;  %1313 = vrot.lane.b32.xlu1 %v4207_v7, %s4116_s22 }
  0x56   :  { %1305 = vrot.lane.b32.xlu0 %v4168_v1, %s4116_s22  ;;  %1307 = vrot.lane.b32.xlu1 %v4193_v5, %s4116_s22 }
  0x5a   :  { %1311 = vrot.lane.b32.xlu0 %v4212_v8, %s4116_s22  ;;  %1303 = vrot.lane.b32.xlu1 %v4184_v4, %s4116_s22 }
  0x5e   :  { %1317 = vrot.lane.b32.xlu0 %v4163_v0, %s4116_s22  ;;  %1315 = vrot.lane.b32.xlu1 %v4198_v6, %s4116_s22 }
  0x62   :  { %1529 = vrot.lane.b32.xlu0 %v4179_v3, %s4117_s23  ;;  %1533 = vrot.lane.b32.xlu1 %v4207_v7, %s4117_s23 }
  0x66   :  { %1525 = vrot.lane.b32.xlu0 %v4168_v1, %s4117_s23  ;;  %1527 = vrot.lane.b32.xlu1 %v4193_v5, %s4117_s23 }
  0x6a   :  { %1531 = vrot.lane.b32.xlu0 %v4212_v8, %s4117_s23  ;;  %1523 = vrot.lane.b32.xlu1 %v4184_v4, %s4117_s23 }
  0x6e   :  { %1537 = vrot.lane.b32.xlu0 %v4163_v0, %s4117_s23  ;;  %1535 = vrot.lane.b32.xlu1 %v4198_v6, %s4117_s23 }
  0x72   :  { %1741 = vrot.lane.b32.xlu0 %v4179_v3, %s4118_s24  ;;  %1745 = vrot.lane.b32.xlu1 %v4207_v7, %s4118_s24 }
  0x74   :  { %v138_v24 = vpop.permute.xlu1 %137  ;;  %v126_v25 = vpop.permute.xlu0 %125 }
  0x75   :  { %v147_v31 = vsel %vm5711_vm7, %v138_v24, %v126_v25 }
  0x76   :  { %1737 = vrot.lane.b32.xlu0 %v4168_v1, %s4118_s24  ;;  %1739 = vrot.lane.b32.xlu1 %v4193_v5, %s4118_s24  ;;  %v160_v37 = vmul.f32 %v4386_v32, %v147_v31 }
  0x78   :  { %v130_v29 = vpop.permute.xlu0 %129  ;;  %v124_v30 = vpop.permute.xlu1 %123 }
  0x79   :  { %v145_v35 = vsel %vm5711_vm7, %v126_v25, %v130_v29 }
  0x7a   :  { %1743 = vrot.lane.b32.xlu0 %v4212_v8, %s4118_s24  ;;  %1735 = vrot.lane.b32.xlu1 %v4184_v4, %s4118_s24  ;;  %v161_v36 = vmul.f32 %v4379_v28, %v145_v35 }
  0x7c   :  { %202 = vmatprep.subr.mxu0 %v161_v36  ;;  %v128_v38 = vpop.permute.xlu0 %127  ;;  %v136_v39 = vpop.permute.xlu1 %135 }
  0x7d   :  { %v144_v40 = vsel %vm5711_vm7, %v124_v30, %v128_v38  ;;  %v146_v41 = vsel %vm5711_vm7, %v136_v39, %v124_v30  ;;  %203 = vmatpush1.msra.mxu0 %v160_v37 }
  0x7e   :  { %1749 = vrot.lane.b32.xlu0 %v4163_v0, %s4118_s24  ;;  %1747 = vrot.lane.b32.xlu1 %v4198_v6, %s4118_s24  ;;  %v157_v42 = vmul.f32 %v4379_v28, %v144_v40  ;;  %v156_v43 = vmul.f32 %v4386_v32, %v146_v41 }
  0x80   :  { %v134_v47 = vpop.permute.xlu0 %133  ;;  %204 = vmatprep.subr.mxu0 %v157_v42  ;;  %v132_v48 = vpop.permute.xlu1 %131 }
  0x81   :  { %v140_v49 = vsel %vm5711_vm7, %v132_v48, %v136_v39  ;;  %205 = vmatpush1.msra.mxu0 %v156_v43  ;;  %v141_v50 = vsel %vm5711_vm7, %v134_v47, %v138_v24  ;;  %v143_v51 = vsel %vm5711_vm7, %v130_v29, %v134_v47  ;;  %v142_v52 = vsel %vm5711_vm7, %v128_v38, %v132_v48  ;;  %vm103_vm7 = vmand %vm95_vm10, %vm4475_vm12 }
  0x82   :  { %v163_v53 = vmul.f32 %v4415_v44, %v141_v50  ;;  %v162_v54 = vmul.f32 %v4420_v45, %v143_v51  ;;  %3952 = vmatmul.mubr.msk.f32.vlgmr.msra.gmra.mxu0 %vm167_vm11, %v3950_v46  ;;  %v159_v60 = vmul.f32 %v4415_v44, %v140_v49  ;;  %v158_v62 = vmul.f32 %v4420_v45, %v142_v52 }
  0x83   :  { %244 = vmatprep.mubr.f32.mxu0 %v5715_v2  ;;  %v4504_v40 = vsel %vm103_vm7, 1.0, %v5715_v2  ;;  %vm4524_vm7 = vcmp.lt.s32.totalorder %v56_v16, 15  ;;  %v4535_v52 = vsel %vm518_vm0, 1.0, %v5715_v2  ;;  %v122_v16 = vld [vmem:[%s5704_s1 + $0x8] sm:$0xff]  ;;  %vm4557_vm0 = vcmp.lt.s32.totalorder %v59_v57, 15 }
  0x84   :  { %279 = vmatprep.subr.mxu1 %v163_v53  ;;  %v71_v58 = vpop.permute.xlu0 %70  ;;  %v75_v59 = vpop.permute.xlu1 %74  ;;  %5804 = vst [vmem:[#allocation10_spill] sm:$0xff] %v4504_v40  ;;  %5808 = vst [vmem:[#allocation12_spill] sm:$0xff] %v4535_v52 }
  0x85   :  { %v90_v61 = vsel %vm5714_vm13, %v71_v58, %v75_v59  ;;  %280 = vmatpush1.msra.mxu1 %v162_v54  ;;  %vm517_vm14 = vmand %vm93_vm8, %vm4524_vm7  ;;  %vm4566_vm8 = vcmp.lt.s32.totalorder %v58_v63, 15 }
  0x86   :  { %281 = vmatprep.subr.mxu1 %v159_v60  ;;  %v118_v9 = vmul.f32 %v4442_v55, %v90_v61  ;;  %3953 = vmatmul.mubr.msk.f32.gmra.mxu0 %vm167_vm11, %v3951_v56  ;;  %v4552_v61 = vsel %vm517_vm14, 1.0, %v5715_v2  ;;  %vm520_vm14 = vmand %vm96_vm9, %vm4557_vm0  ;;  %vm724_vm9 = vcmp.lt.s32.totalorder %v4258_v10, 1 }
  0x87   :  { %282 = vmatpush1.msra.mxu1 %v158_v62  ;;  %398 = vmatprep.mubr.f32.mxu0 %v5715_v2  ;;  %5809 = vst [vmem:[#allocation13_spill] sm:$0xff] %v4552_v61 }
  0x88   :  { %v83_v24 = vpop.permute.xlu0 %82  ;;  %362 = vmatprep.subr.mxu0 %v118_v9  ;;  %v69_v25 = vpop.permute.xlu1 %68  ;;  %3954 = vmatmul.mubr.msk.f32.vlgmr.msra.gmra.mxu1 %vm167_vm11, %v3950_v46 }
  0x89   :  { %v92_v26 = vsel %vm5714_vm13, %v83_v24, %v71_v58  ;;  %321 = vmatprep.mubr.f32.mxu1 %v5715_v2 }
  0x8a   :  { %v117_v29 = vmul.f32 %v4461_v12, %v92_v26 }
  0x8c   :  { %v73_v30 = vpop.permute.xlu0 %72  ;;  %363 = vmatpush1.msra.mxu0 %v117_v29  ;;  %v81_v31 = vpop.permute.xlu1 %80  ;;  %3955 = vmatmul.mubr.msk.f32.gmra.mxu1 %vm167_vm11, %v3951_v56 }
  0x8d   :  { %v89_v36 = vsel %vm5714_vm13, %v69_v25, %v73_v30  ;;  %v91_v37 = vsel %vm5714_vm13, %v81_v31, %v69_v25  ;;  %475 = vmatprep.mubr.f32.mxu1 %v5715_v2 }
  0x8e   :  { %v113_v38 = vmul.f32 %v4461_v12, %v91_v37  ;;  %v114_v39 = vmul.f32 %v4442_v55, %v89_v36  ;;  %v4592_v37 = vsel %vm520_vm14, 1.0, %v5715_v2  ;;  %vm5830_vm14 = vcmp.lt.s32.totalorder %v4288_v18, 15 }
  0x8f   :  { %5815 = vst [vmem:[#allocation15_spill] sm:$0xff] %v4592_v37 }
  0x90   :  { %v79_v41 = vpop.permute.xlu0 %78  ;;  %364 = vmatprep.subr.mxu0 %v114_v39  ;;  %v77_v42 = vpop.permute.xlu1 %76 }
  0x91   :  { %v86_v43 = vsel %vm5714_vm13, %v79_v41, %v83_v24  ;;  %v88_v46 = vsel %vm5714_vm13, %v75_v59, %v79_v41  ;;  %v85_v47 = vsel %vm5714_vm13, %v77_v42, %v81_v31  ;;  %365 = vmatpush1.msra.mxu0 %v113_v38  ;;  %v87_v50 = vsel %vm5714_vm13, %v73_v30, %v77_v42  ;;  %vm519_vm13 = vmand %vm95_vm10, %vm4566_vm8  ;;  %v3964_v38 = vld [vmem:[%s5704_s1 + $0x20] sm:$0xff] }
  0x92   :  { %v119_v49 = vmul.f32 %v4504_v40, %v88_v46  ;;  %v120_v51 = vmul.f32 %v4507_v11, %v86_v43  ;;  %3956 = vmatmul.mubr.msk.f32.vlgmr.msra.gmra.mxu0 %vm167_vm11, %v121_v13  ;;  %v116_v56 = vmul.f32 %v4507_v11, %v85_v47  ;;  %v115_v58 = vmul.f32 %v4504_v40, %v87_v50 }
  0x93   :  { %404 = vmatprep.mubr.f32.mxu0 %v5715_v2  ;;  %v4589_v36 = vsel %vm519_vm13, 1.0, %v5715_v2  ;;  %v4612_v50 = vsel %vm4284_vm1, 1.0, %v5715_v2  ;;  %vm1107_vm1 = vcmp.lt.s32.totalorder %v4258_v10, 127  ;;  %vm1331_vm10 = vcmp.lt.s32.totalorder %v4388_v33, 15  ;;  %v4020_v33 = vld [vmem:[%s5704_s1 + $0x80] sm:$0xff] }
  0x94   :  { %v491_v53 = vpop.permute.xlu0 %490  ;;  %439 = vmatprep.subr.mxu1 %v120_v51  ;;  %v495_v54 = vpop.permute.xlu1 %494  ;;  %5814 = vst [vmem:[#allocation14_spill] sm:$0xff] %v4589_v36  ;;  %5816 = vst [vmem:[#allocation16_spill] sm:$0xff] %v4612_v50  ;;  %v3965_v51 = vld [vmem:[%s5704_s1 + $0x28] sm:$0xff] }
  0x95   :  { %v510_v59 = vsel %vm504_vm6, %v491_v53, %v495_v54  ;;  %440 = vmatpush1.msra.mxu1 %v119_v49  ;;  %vm1335_vm13 = vmand %vm1331_vm10, %vm4466_vm15 }
  0x96   :  { %441 = vmatprep.subr.mxu1 %v116_v56  ;;  %v534_v60 = vmul.f32 %v4535_v52, %v510_v59  ;;  %3957 = vmatmul.mubr.msk.f32.gmra.mxu0 %vm167_vm11, %v122_v16  ;;  %v4627_v59 = vsel %vm4304_vm3, 1.0, %v5715_v2  ;;  %vm1319_vm3 = vcmp.lt.s32.totalorder %v4258_v10, 113  ;;  %v4797_v15 = vsel %vm1335_vm13, 1.0, %v5715_v2 }
  0x97   :  { %442 = vmatpush1.msra.mxu1 %v115_v58  ;;  %610 = vmatprep.mubr.f32.mxu0 %v5715_v2  ;;  %5817 = vst [vmem:[#allocation17_spill] sm:$0xff] %v4627_v59  ;;  %5827 = vst [vmem:[#allocation27_spill] sm:$0xff] %v4797_v15 }
  0x98   :  { %v503_v9 = vpop.permute.xlu0 %502  ;;  %574 = vmatprep.subr.mxu0 %v534_v60  ;;  %v489_v24 = vpop.permute.xlu1 %488  ;;  %3958 = vmatmul.mubr.msk.f32.vlgmr.msra.gmra.mxu1 %vm167_vm11, %v121_v13 }
  0x99   :  { %v512_v25 = vsel %vm504_vm6, %v503_v9, %v491_v53  ;;  %481 = vmatprep.mubr.f32.mxu1 %v5715_v2 }
  0x9a   :  { %v533_v22 = vmul.f32 %v4552_v61, %v512_v25 }
  0x9c   :  { %v493_v57 = vpop.permute.xlu0 %492  ;;  %575 = vmatpush1.msra.mxu0 %v533_v22  ;;  %v501_v29 = vpop.permute.xlu1 %500  ;;  %3959 = vmatmul.mubr.msk.f32.gmra.mxu1 %vm167_vm11, %v122_v16 }
  0x9d   :  { %v509_v23 = vsel %vm504_vm6, %v489_v24, %v493_v57  ;;  %v511_v63 = vsel %vm504_vm6, %v501_v29, %v489_v24  ;;  %687 = vmatprep.mubr.f32.mxu1 %v5715_v2 }
  0x9e   :  { %v529_v30 = vmul.f32 %v4552_v61, %v511_v63  ;;  %v530_v31 = vmul.f32 %v4535_v52, %v509_v23 }
  0xa0   :  { %v499_v39 = vpop.permute.xlu0 %498  ;;  %576 = vmatprep.subr.mxu0 %v530_v31  ;;  %v497_v13 = vpop.permute.xlu1 %496  ;;  %v3974_v31 = vld [vmem:[%s5704_s1 + $0x30] sm:$0xff] }
  0xa1   :  { %v506_v41 = vsel %vm504_vm6, %v499_v39, %v503_v9  ;;  %v508_v42 = vsel %vm504_vm6, %v495_v54, %v499_v39  ;;  %v505_v43 = vsel %vm504_vm6, %v497_v13, %v501_v29  ;;  %577 = vmatpush1.msra.mxu0 %v529_v30  ;;  %v507_v47 = vsel %vm504_vm6, %v493_v57, %v497_v13 }
  0xa2   :  { %v535_v46 = vmul.f32 %v4589_v36, %v508_v42  ;;  %v536_v49 = vmul.f32 %v4592_v37, %v506_v41  ;;  %3966 = vmatmul.mubr.msk.f32.vlgmr.msra.gmra.mxu0 %vm167_vm11, %v3964_v38  ;;  %v532_v54 = vmul.f32 %v4592_v37, %v505_v43  ;;  %v531_v56 = vmul.f32 %v4589_v36, %v507_v47 }
  0xa3   :  { %616 = vmatprep.mubr.f32.mxu0 %v5715_v2  ;;  %v4646_v30 = vsel %vm4475_vm12, 1.0, %v5715_v2 }
  0xa4   :  { %v711_v16 = vpop.permute.xlu0 %710  ;;  %651 = vmatprep.subr.mxu1 %v536_v49  ;;  %v715_v53 = vpop.permute.xlu1 %714  ;;  %5818 = vst [vmem:[#allocation18_spill] sm:$0xff] %v4646_v30 }
  0xa5   :  { %v730_v58 = vsel %vm724_vm9, %v711_v16, %v715_v53  ;;  %652 = vmatpush1.msra.mxu1 %v535_v46 }
  0xa6   :  { %653 = vmatprep.subr.mxu1 %v532_v54  ;;  %v746_v17 = vmul.f32 %v4612_v50, %v730_v58  ;;  %3967 = vmatmul.mubr.msk.f32.gmra.mxu0 %vm167_vm11, %v3965_v51 }
  0xa7   :  { %654 = vmatpush1.msra.mxu1 %v531_v56  ;;  %822 = vmatprep.mubr.f32.mxu0 %v5715_v2 }
  0xa8   :  { %v723_v60 = vpop.permute.xlu0 %722  ;;  %786 = vmatprep.subr.mxu0 %v746_v17  ;;  %v709_v9 = vpop.permute.xlu1 %708  ;;  %3968 = vmatmul.mubr.msk.f32.vlgmr.msra.gmra.mxu1 %vm167_vm11, %v3964_v38  ;;  %v4654_v38 = vsel %vm4466_vm15, 1.0, %v5715_v2  ;;  %v4690_v17 = vsel %vm4524_vm7, 1.0, %v5715_v2  ;;  %vm1539_vm15 = vcmp.lt.s32.totalorder %v4258_v10, 112 }
  0xa9   :  { %v732_v24 = vsel %vm724_vm9, %v723_v60, %v711_v16  ;;  %693 = vmatprep.mubr.f32.mxu1 %v5715_v2  ;;  %5819 = vst [vmem:[#allocation19_spill] sm:$0xff] %v4654_v38  ;;  %v4677_v16 = vsel %vm4492_vm4, 1.0, %v5715_v2  ;;  %5821 = vst [vmem:[#allocation21_spill] sm:$0xff] %v4690_v17 }
  0xaa   :  { %v745_v25 = vmul.f32 %v4627_v59, %v732_v24  ;;  %5820 = vst [vmem:[#allocation20_spill] sm:$0xff] %v4677_v16 }
  0xac   :  { %v713_v22 = vpop.permute.xlu0 %712  ;;  %787 = vmatpush1.msra.mxu0 %v745_v25  ;;  %v721_v57 = vpop.permute.xlu1 %720  ;;  %3969 = vmatmul.mubr.msk.f32.gmra.mxu1 %vm167_vm11, %v3965_v51  ;;  %v3975_v51 = vld [vmem:[%s5704_s1 + $0x38] sm:$0xff]  ;;  %v3981_v25 = vld [vmem:[%s5704_s1 + $0x48] sm:$0xff] }
  0xad   :  { %v729_v20 = vsel %vm724_vm9, %v709_v9, %v713_v22  ;;  %v731_v29 = vsel %vm724_vm9, %v721_v57, %v709_v9  ;;  %899 = vmatprep.mubr.f32.mxu1 %v5715_v2 }
  0xae   :  { %v741_v23 = vmul.f32 %v4627_v59, %v731_v29  ;;  %v742_v63 = vmul.f32 %v4612_v50, %v729_v20  ;;  %v4722_v29 = vsel %vm4566_vm8, 1.0, %v5715_v2 }
  0xaf   :  { %5822 = vst [vmem:[#allocation22_spill] sm:$0xff] %v4722_v29 }
  0xb0   :  { %v719_v39 = vpop.permute.xlu0 %718  ;;  %788 = vmatprep.subr.mxu0 %v742_v63  ;;  %v717_v13 = vpop.permute.xlu1 %716 }
  0xb1   :  { %v726_v41 = vsel %vm724_vm9, %v719_v39, %v723_v60  ;;  %v728_v42 = vsel %vm724_vm9, %v715_v53, %v719_v39  ;;  %v725_v43 = vsel %vm724_vm9, %v717_v13, %v721_v57  ;;  %789 = vmatpush1.msra.mxu0 %v741_v23  ;;  %v727_v47 = vsel %vm724_vm9, %v713_v22, %v717_v13  ;;  %v3990_v23 = vld [vmem:[%s5704_s1 + $0x50] sm:$0xff] }
  0xb2   :  { %v747_v46 = vmul.f32 %v4646_v30, %v728_v42  ;;  %3976 = vmatmul.mubr.msk.f32.vlgmr.msra.gmra.mxu0 %vm167_vm11, %v3974_v31  ;;  %v748_v49 = vmul.f32 %v4654_v38, %v726_v41  ;;  %957 = vmatprep.subr.mxu0 %v4179_v3  ;;  %v744_v3 = vmul.f32 %v4654_v38, %v725_v43 }
  0xb3   :  { %828 = vmatprep.mubr.f32.mxu0 %v5715_v2  ;;  %958 = vmatpush1.msra.mxu0 %v4168_v1  ;;  %v743_v56 = vmul.f32 %v4646_v30, %v727_v47  ;;  %v3991_v47 = vld [vmem:[%s5704_s1 + $0x58] sm:$0xff] }
  0xb4   :  { %v1098_v53 = vpop.permute.xlu0 %1097  ;;  %863 = vmatprep.subr.mxu1 %v748_v49  ;;  %v1102_v54 = vpop.permute.xlu1 %1101  ;;  %959 = vmatprep.subr.mxu0 %v4193_v5  ;;  %v3980_v5 = vld [vmem:[%s5704_s1 + $0x40] sm:$0xff]  ;;  %v4754_v49 = vsel %vm4294_vm2, 1.0, %v5715_v2  ;;  %vm1330_vm2 = vcmp.lt.s32.totalorder %v4390_v34, 15 }
  0xb5   :  { %v1111_v1 = vsel %vm1107_vm1, %v1098_v53, %v1102_v54  ;;  %864 = vmatpush1.msra.mxu1 %v747_v46  ;;  %960 = vmatpush1.msra.mxu0 %v4184_v4  ;;  %5824 = vst [vmem:[#allocation24_spill] sm:$0xff] %v4754_v49 }
  0xb6   :  { %3977 = vmatmul.mubr.msk.f32.gmra.mxu0 %vm167_vm11, %v3975_v51  ;;  %865 = vmatprep.subr.mxu1 %v744_v3  ;;  %v1129_v58 = vmul.f32 %v4677_v16, %v1111_v1  ;;  %v4767_v1 = vsel %vm4313_vm5, 1.0, %v5715_v2  ;;  %vm1334_vm5 = vmand %vm1330_vm2, %vm4475_vm12  ;;  %vm5828_vm12 = vcmp.lt.s32.totalorder %v4273_v14, 15 }
  0xb7   :  { %866 = vmatpush1.msra.mxu1 %v743_v56  ;;  %993 = vmatprep.mubr.f32.mxu0 %v5715_v2  ;;  %5825 = vst [vmem:[#allocation25_spill] sm:$0xff] %v4767_v1 }
  0xb8   :  { %v1094_v60 = vpop.permute.xlu0 %1093  ;;  %3978 = vmatmul.mubr.msk.f32.vlgmr.msra.gmra.mxu1 %vm167_vm11, %v3974_v31  ;;  %1169 = vmatprep.subr.mxu0 %v1129_v58  ;;  %v1096_v4 = vpop.permute.xlu1 %1095 }
  0xb9   :  { %v1113_v9 = vsel %vm1107_vm1, %v1094_v60, %v1098_v53  ;;  %905 = vmatprep.mubr.f32.mxu1 %v5715_v2  ;;  %1034 = vmatprep.subr.mxu1 %v4163_v0 }
  0xba   :  { %v1128_v24 = vmul.f32 %v4690_v17, %v1113_v9  ;;  %3982 = vmatmul.mubr.msk.f32.vlgmr.msra.gmra.mxu0 %vm167_vm11, %v3980_v5  ;;  %1035 = vmatpush1.msra.mxu1 %v4207_v7 }
  0xbb   :  { %999 = vmatprep.mubr.f32.mxu0 %v5715_v2  ;;  %1036 = vmatprep.subr.mxu1 %v4198_v6 }
  0xbc   :  { %v1100_v22 = vpop.permute.xlu0 %1099  ;;  %3979 = vmatmul.mubr.msk.f32.gmra.mxu1 %vm167_vm11, %v3975_v51  ;;  %1170 = vmatpush1.msra.mxu0 %v1128_v24  ;;  %v1092_v57 = vpop.permute.xlu1 %1091 }
  0xbd   :  { %v1110_v0 = vsel %vm1107_vm1, %v1096_v4, %v1100_v22  ;;  %v1112_v20 = vsel %vm1107_vm1, %v1092_v57, %v1096_v4  ;;  %1037 = vmatpush1.msra.mxu1 %v4212_v8  ;;  %1070 = vmatprep.mubr.f32.mxu1 %v5715_v2  ;;  %v4731_v8 = vsel %vm4557_vm0, 1.0, %v5715_v2 }
  0xbe   :  { %v1124_v7 = vmul.f32 %v4690_v17, %v1112_v20  ;;  %3983 = vmatmul.mubr.msk.f32.gmra.mxu0 %vm167_vm11, %v3981_v25  ;;  %v1125_v6 = vmul.f32 %v4677_v16, %v1110_v0  ;;  %5823 = vst [vmem:[#allocation23_spill] sm:$0xff] %v4731_v8  ;;  %v4000_v0 = vld [vmem:[%s5704_s1 + $0x60] sm:$0xff] }
  0xbf   :  { %1205 = vmatprep.mubr.f32.mxu0 %v5715_v2 }
  0xc0   :  { %v1106_v63 = vpop.permute.xlu0 %1105  ;;  %3984 = vmatmul.mubr.msk.f32.vlgmr.msra.gmra.mxu1 %vm167_vm11, %v3980_v5  ;;  %1171 = vmatprep.subr.mxu0 %v1125_v6  ;;  %v1104_v31 = vpop.permute.xlu1 %1103 }
  0xc1   :  { %v1109_v39 = vsel %vm1107_vm1, %v1102_v54, %v1106_v63  ;;  %v1115_v13 = vsel %vm1107_vm1, %v1106_v63, %v1094_v60  ;;  %v1114_v41 = vsel %vm1107_vm1, %v1104_v31, %v1092_v57  ;;  %1172 = vmatpush1.msra.mxu0 %v1124_v7  ;;  %v1108_v43 = vsel %vm1107_vm1, %v1100_v22, %v1104_v31 }
  0xc2   :  { %v1130_v42 = vmul.f32 %v4722_v29, %v1109_v39  ;;  %3992 = vmatmul.mubr.msk.f32.vlgmr.msra.gmra.mxu0 %vm167_vm11, %v3990_v23  ;;  %1076 = vmatprep.mubr.f32.mxu1 %v5715_v2  ;;  %v1131_v46 = vmul.f32 %v4731_v8, %v1115_v13  ;;  %v1127_v54 = vmul.f32 %v4731_v8, %v1114_v41  ;;  %v4794_v57 = vsel %vm1334_vm5, 1.0, %v5715_v2  ;;  %v4001_v41 = vld [vmem:[%s5704_s1 + $0x68] sm:$0xff]  ;;  %vm5834_vm5 = vmmov %vm5828_vm12 }
  0xc3   :  { %1211 = vmatprep.mubr.f32.mxu0 %v5715_v2  ;;  %v1126_v3 = vmul.f32 %v4722_v29, %v1108_v43  ;;  %5826 = vst [vmem:[#allocation26_spill] sm:$0xff] %v4794_v57  ;;  %vm1761_vm13 = vmand %vm5834_vm5, %vm4492_vm4  ;;  %vm1751_vm4 = vcmp.lt.s32.totalorder %v4258_v10, 111 }
  0xc4   :  { %v1310_v51 = vpop.permute.xlu0 %1309  ;;  %3985 = vmatmul.mubr.msk.f32.gmra.mxu1 %vm167_vm11, %v3981_v25  ;;  %1246 = vmatprep.subr.mxu1 %v1131_v46  ;;  %v1314_v53 = vpop.permute.xlu1 %1313  ;;  %v4878_v14 = vsel %vm1761_vm13, 1.0, %v5715_v2  ;;  %vm1763_vm5 = vmand %vm1331_vm10, %vm4557_vm0 }
  0xc5   :  { %v1323_v56 = vsel %vm1319_vm3, %v1310_v51, %v1314_v53  ;;  %1247 = vmatpush1.msra.mxu1 %v1130_v42  ;;  %1282 = vmatprep.mubr.f32.mxu1 %v5715_v2  ;;  %v4821_v42 = vsel %vm5828_vm12, 1.0, %v5715_v2  ;;  %5835 = vst [vmem:[#allocation32_spill] sm:$0xff] %v4878_v14  ;;  %vm5836_vm12 = vmmov %vm5830_vm14  ;;  %v4923_v62 = vsel %vm1763_vm5, 1.0, %v5715_v2 }
  0xc6   :  { %3993 = vmatmul.mubr.msk.f32.gmra.mxu0 %vm167_vm11, %v3991_v47  ;;  %1248 = vmatprep.subr.mxu1 %v1127_v54  ;;  %v1349_v19 = vmul.f32 %v4754_v49, %v1323_v56  ;;  %5829 = vst [vmem:[#allocation28_spill] sm:$0xff] %v4821_v42  ;;  %5839 = vst [vmem:[#allocation35_spill] sm:$0xff] %v4923_v62 }
  0xc7   :  { %1249 = vmatpush1.msra.mxu1 %v1126_v3  ;;  %1425 = vmatprep.mubr.f32.mxu0 %v5715_v2  ;;  %v4832_v3 = vsel %vm5830_vm14, 1.0, %v5715_v2  ;;  %vm1760_vm14 = vmand %vm5836_vm12, %vm4524_vm7 }
  0xc8   :  { %v1306_v58 = vpop.permute.xlu0 %1305  ;;  %3994 = vmatmul.mubr.msk.f32.vlgmr.msra.gmra.mxu1 %vm167_vm11, %v3990_v23  ;;  %1389 = vmatprep.subr.mxu0 %v1349_v19  ;;  %v1308_v5 = vpop.permute.xlu1 %1307  ;;  %5831 = vst [vmem:[#allocation29_spill] sm:$0xff] %v4832_v3  ;;  %vm1762_vm7 = vmand %vm1330_vm2, %vm4566_vm8 }
  0xc9   :  { %v1325_v60 = vsel %vm1319_vm3, %v1306_v58, %v1310_v51  ;;  %1288 = vmatprep.mubr.f32.mxu1 %v5715_v2 }
  0xca   :  { %v1348_v21 = vmul.f32 %v4767_v1, %v1325_v60 }
  0xcc   :  { %v1312_v4 = vpop.permute.xlu0 %1311  ;;  %3995 = vmatmul.mubr.msk.f32.gmra.mxu1 %vm167_vm11, %v3991_v47  ;;  %1390 = vmatpush1.msra.mxu0 %v1348_v21  ;;  %v1304_v9 = vpop.permute.xlu1 %1303 }
  0xcd   :  { %v1322_v24 = vsel %vm1319_vm3, %v1308_v5, %v1312_v4  ;;  %v1324_v25 = vsel %vm1319_vm3, %v1304_v9, %v1308_v5  ;;  %1502 = vmatprep.mubr.f32.mxu1 %v5715_v2 }
  0xce   :  { %v1345_v27 = vmul.f32 %v4754_v49, %v1322_v24  ;;  %v1344_v22 = vmul.f32 %v4767_v1, %v1324_v25 }
  0xd0   :  { %v1318_v20 = vpop.permute.xlu0 %1317  ;;  %1391 = vmatprep.subr.mxu0 %v1345_v27  ;;  %v1316_v7 = vpop.permute.xlu1 %1315  ;;  %v4851_v27 = vsel %vm1330_vm2, 1.0, %v5715_v2 }
  0xd1   :  { %v1321_v6 = vsel %vm1319_vm3, %v1314_v53, %v1318_v20  ;;  %v1327_v23 = vsel %vm1319_vm3, %v1318_v20, %v1306_v58  ;;  %v1326_v63 = vsel %vm1319_vm3, %v1316_v7, %v1304_v9  ;;  %1392 = vmatpush1.msra.mxu0 %v1344_v22  ;;  %v1320_v13 = vsel %vm1319_vm3, %v1312_v4, %v1316_v7 }
  0xd2   :  { %v1350_v31 = vmul.f32 %v4794_v57, %v1321_v6  ;;  %v1351_v39 = vmul.f32 %v4797_v15, %v1327_v23  ;;  %4002 = vmatmul.mubr.msk.f32.vlgmr.msra.gmra.mxu0 %vm167_vm11, %v4000_v0  ;;  %v1347_v47 = vmul.f32 %v4797_v15, %v1326_v63  ;;  %v1346_v51 = vmul.f32 %v4794_v57, %v1320_v13  ;;  %v4011_v13 = vld [vmem:[%s5704_s1 + $0x78] sm:$0xff] }
  0xd3   :  { %1431 = vmatprep.mubr.f32.mxu0 %v5715_v2  ;;  %5832 = vst [vmem:[#allocation30_spill] sm:$0xff] %v4851_v27  ;;  %v4856_v22 = vsel %vm1331_vm10, 1.0, %v5715_v2 }
  0xd4   :  { %v1530_v43 = vpop.permute.xlu0 %1529  ;;  %1466 = vmatprep.subr.mxu1 %v1351_v39  ;;  %v1534_v46 = vpop.permute.xlu1 %1533  ;;  %5833 = vst [vmem:[#allocation31_spill] sm:$0xff] %v4856_v22 }
  0xd5   :  { %v1543_v53 = vsel %vm1539_vm15, %v1530_v43, %v1534_v46  ;;  %1467 = vmatpush1.msra.mxu1 %v1350_v31 }
  0xd6   :  { %4003 = vmatmul.mubr.msk.f32.gmra.mxu0 %vm167_vm11, %v4001_v41  ;;  %1468 = vmatprep.subr.mxu1 %v1347_v47  ;;  %v1561_v54 = vmul.f32 %v4821_v42, %v1543_v53 }
  0xd7   :  { %1469 = vmatpush1.msra.mxu1 %v1346_v51  ;;  %1637 = vmatprep.mubr.f32.mxu0 %v5715_v2 }
  0xd8   :  { %v1526_v56 = vpop.permute.xlu0 %1525  ;;  %4004 = vmatmul.mubr.msk.f32.vlgmr.msra.gmra.mxu1 %vm167_vm11, %v4000_v0  ;;  %1601 = vmatprep.subr.mxu0 %v1561_v54  ;;  %v1528_v19 = vpop.permute.xlu1 %1527  ;;  %v4010_v0 = vld [vmem:[%s5704_s1 + $0x70] sm:$0xff]  ;;  %v4895_v54 = vsel %vm1760_vm14, 1.0, %v5715_v2 }
  0xd9   :  { %v1545_v58 = vsel %vm1539_vm15, %v1526_v56, %v1530_v43  ;;  %1508 = vmatprep.mubr.f32.mxu1 %v5715_v2  ;;  %5837 = vst [vmem:[#allocation33_spill] sm:$0xff] %v4895_v54 }
  0xda   :  { %v1560_v5 = vmul.f32 %v4832_v3, %v1545_v58 }
  0xdc   :  { %v1532_v60 = vpop.permute.xlu0 %1531  ;;  %4005 = vmatmul.mubr.msk.f32.gmra.mxu1 %vm167_vm11, %v4001_v41  ;;  %1602 = vmatpush1.msra.mxu0 %v1560_v5  ;;  %v1524_v21 = vpop.permute.xlu1 %1523 }
  0xdd   :  { %v1542_v4 = vsel %vm1539_vm15, %v1528_v19, %v1532_v60  ;;  %v1544_v9 = vsel %vm1539_vm15, %v1524_v21, %v1528_v19  ;;  %1714 = vmatprep.mubr.f32.mxu1 %v5715_v2 }
  0xde   :  { %v1557_v24 = vmul.f32 %v4821_v42, %v1542_v4  ;;  %v1556_v25 = vmul.f32 %v4832_v3, %v1544_v9  ;;  %v4920_v4 = vsel %vm1762_vm7, 1.0, %v5715_v2 }
  0xdf   :  { %5838 = vst [vmem:[#allocation34_spill] sm:$0xff] %v4920_v4 }
  0xe0   :  { %v1538_v20 = vpop.permute.xlu0 %1537  ;;  %1603 = vmatprep.subr.mxu0 %v1557_v24  ;;  %v1536_v7 = vpop.permute.xlu1 %1535 }
  0xe1   :  { %v1541_v6 = vsel %vm1539_vm15, %v1534_v46, %v1538_v20  ;;  %v1547_v23 = vsel %vm1539_vm15, %v1538_v20, %v1526_v56  ;;  %v1546_v63 = vsel %vm1539_vm15, %v1536_v7, %v1524_v21  ;;  %1604 = vmatpush1.msra.mxu0 %v1556_v25  ;;  %v1540_v35 = vsel %vm1539_vm15, %v1532_v60, %v1536_v7 }
  0xe2   :  { %v1562_v31 = vmul.f32 %v4851_v27, %v1541_v6  ;;  %v1563_v39 = vmul.f32 %v4856_v22, %v1547_v23  ;;  %4012 = vmatmul.mubr.msk.f32.vlgmr.msra.gmra.mxu0 %vm167_vm11, %v4010_v0  ;;  %v1559_v41 = vmul.f32 %v4856_v22, %v1546_v63  ;;  %v1558_v47 = vmul.f32 %v4851_v27, %v1540_v35  ;;  %v4021_v63 = vld [vmem:[%s5704_s1 + $0x88] sm:$0xff] }
  0xe3   :  { %1643 = vmatprep.mubr.f32.mxu0 %v5715_v2 }
  0xe4   :  { %v1742_v43 = vpop.permute.xlu0 %1741  ;;  %1678 = vmatprep.subr.mxu1 %v1563_v39  ;;  %v1746_v46 = vpop.permute.xlu1 %1745 }
  0xe5   :  { %v1755_v51 = vsel %vm1751_vm4, %v1742_v43, %v1746_v46  ;;  %1679 = vmatpush1.msra.mxu1 %v1562_v31 }
  0xe6   :  { %v1777_v53 = vmul.f32 %v4878_v14, %v1755_v51  ;;  %4013 = vmatmul.mubr.msk.f32.gmra.mxu0 %vm167_vm11, %v4011_v13  ;;  %1680 = vmatprep.subr.mxu1 %v1559_v41 }
  0xe7   :  { %1681 = vmatpush1.msra.mxu1 %v1558_v47  ;;  %1853 = vmatprep.mubr.f32.mxu0 %v5715_v2 }
  0xe8   :  { %v1738_v48 = vpop.permute.xlu0 %1737  ;;  %4014 = vmatmul.mubr.msk.f32.vlgmr.msra.gmra.mxu1 %vm167_vm11, %v4010_v0  ;;  %1817 = vmatprep.subr.mxu0 %v1777_v53  ;;  %v1740_v18 = vpop.permute.xlu1 %1739 }
  0xe9   :  { %v1757_v56 = vsel %vm1751_vm4, %v1738_v48, %v1742_v43  ;;  %1720 = vmatprep.mubr.f32.mxu1 %v5715_v2 }
  0xea   :  { %v1776_v19 = vmul.f32 %v4895_v54, %v1757_v56 }
  0xec   :  { %v1744_v58 = vpop.permute.xlu0 %1743  ;;  %4015 = vmatmul.mubr.msk.f32.gmra.mxu1 %vm167_vm11, %v4011_v13  ;;  %1818 = vmatpush1.msra.mxu0 %v1776_v19  ;;  %v1736_v5 = vpop.permute.xlu1 %1735 }
  0xed   :  { %v1754_v60 = vsel %vm1751_vm4, %v1740_v18, %v1744_v58  ;;  %v1756_v21 = vsel %vm1751_vm4, %v1736_v5, %v1740_v18  ;;  %1930 = vmatprep.mubr.f32.mxu1 %v5715_v2 }
  0xee   :  { %v1773_v34 = vmul.f32 %v4878_v14, %v1754_v60  ;;  %v1772_v26 = vmul.f32 %v4895_v54, %v1756_v21 }
  0xf0   :  { %v1750_v9 = vpop.permute.xlu0 %1749  ;;  %1819 = vmatprep.subr.mxu0 %v1773_v34  ;;  %v1748_v24 = vpop.permute.xlu1 %1747 }
  0xf1   :  { %v1753_v25 = vsel %vm1751_vm4, %v1746_v46, %v1750_v9  ;;  %v1759_v0 = vsel %vm1751_vm4, %v1750_v9, %v1738_v48  ;;  %v1758_v20 = vsel %vm1751_vm4, %v1748_v24, %v1736_v5  ;;  %1820 = vmatpush1.msra.mxu0 %v1772_v26  ;;  %v1752_v23 = vsel %vm1751_vm4, %v1744_v58, %v1748_v24 }
  0xf2   :  { %v1778_v7 = vmul.f32 %v4920_v4, %v1753_v25  ;;  %v1779_v6 = vmul.f32 %v4923_v62, %v1759_v0  ;;  %4022 = vmatmul.mubr.msk.f32.vlgmr.msra.gmra.mxu0 %vm167_vm11, %v4020_v33  ;;  %v1775_v31 = vmul.f32 %v4923_v62, %v1758_v20  ;;  %v1774_v39 = vmul.f32 %v4920_v4, %v1752_v23 }
  0xf3   :  { %1859 = vmatprep.mubr.f32.mxu0 %v5715_v2 }
  0xf4   :  { %1894 = vmatprep.subr.mxu1 %v1779_v6 }
  0xf5   :  { %1895 = vmatpush1.msra.mxu1 %v1778_v7 }
  0xf6   :  { %4023 = vmatmul.mubr.msk.f32.gmra.mxu0 %vm167_vm11, %v4021_v63  ;;  %1896 = vmatprep.subr.mxu1 %v1775_v31 }
  0xf7   :  { %1897 = vmatpush1.msra.mxu1 %v1774_v39  ;;  %2184 = vmatprep.mubr.f32.mxu0 %v5715_v2 }
  0xf8   :  { %4024 = vmatmul.mubr.msk.f32.vlgmr.msra.gmra.mxu1 %vm167_vm11, %v4020_v33 }
  0xf9   :  { %1936 = vmatprep.mubr.f32.mxu1 %v5715_v2 }
  0xfc   :  { %4025 = vmatmul.mubr.msk.f32.gmra.mxu1 %vm167_vm11, %v4021_v63 }
  0xfd   :  { %2261 = vmatprep.mubr.f32.mxu1 %v5715_v2 }
 0x142   :  { %v240_v35 = vpop.f32.mrf.mxu0 }
 0x144   :  { %v242_v13 = vpop.f32.mrf.mxu0 }
 0x146   :  { %v246_v43 = vpop.f32.mrf.mxu0 }
 0x148   :  { %v317_v41 = vpop.f32.mrf.mxu1  ;;  %v248_v47 = vpop.f32.mrf.mxu0 }
 0x14a   :  { %v319_v46 = vpop.f32.mrf.mxu1 }
 0x14c   :  { %v323_v51 = vpop.f32.mrf.mxu1 }
 0x14e   :  { %v4951_v48 = vpop.f32.mrf.mxu1 }
 0x14f   :  { %5840 = vst [vmem:[#allocation36_spill] sm:$0xff] %v4951_v48 }
 0x152   :  { %v400_v53 = vpop.f32.mrf.mxu0 }
 0x153   :  { %v401_v37 = vadd.f32 %v400_v53, %v240_v35 }
 0x154   :  { %v402_v18 = vpop.f32.mrf.mxu0 }
 0x155   :  { %v403_v12 = vadd.f32 %v402_v18, %v242_v13 }
 0x156   :  { %v406_v19 = vpop.f32.mrf.mxu0  ;;  %v5847_v18 = vld [vmem:[#allocation36_spill] sm:$0xff] }
 0x157   :  { %v407_v11 = vadd.f32 %v406_v19, %v246_v43 }
 0x158   :  { %v477_v56 = vpop.f32.mrf.mxu1  ;;  %v408_v5 = vpop.f32.mrf.mxu0 }
 0x159   :  { %v409_v45 = vadd.f32 %v408_v5, %v248_v47  ;;  %v478_v44 = vadd.f32 %v477_v56, %v317_v41 }
 0x15a   :  { %v479_v58 = vpop.f32.mrf.mxu1 }
 0x15b   :  { %v480_v10 = vadd.f32 %v479_v58, %v319_v46 }
 0x15c   :  { %v483_v60 = vpop.f32.mrf.mxu1 }
 0x15e   :  { %v485_v34 = vpop.f32.mrf.mxu1 }
 0x162   :  { %v612_v21 = vpop.f32.mrf.mxu0 }
 0x163   :  { %v700_v32 = vadd.f32 %v612_v21, %v401_v37 }
 0x164   :  { %v614_v26 = vpop.f32.mrf.mxu0 }
 0x165   :  { %v701_v28 = vadd.f32 %v614_v26, %v403_v12 }
 0x166   :  { %v618_v9 = vpop.f32.mrf.mxu0 }
 0x168   :  { %v689_v33 = vpop.f32.mrf.mxu1  ;;  %v620_v25 = vpop.f32.mrf.mxu0 }
 0x169   :  { %v705_v48 = vadd.f32 %v620_v25, %v409_v45  ;;  %v702_v35 = vadd.f32 %v689_v33, %v478_v44 }
 0x16a   :  { %v691_v24 = vpop.f32.mrf.mxu1 }
 0x16b   :  { %v703_v19 = vadd.f32 %v691_v24, %v480_v10 }
 0x16c   :  { %v695_v0 = vpop.f32.mrf.mxu1 }
 0x16e   :  { %v697_v6 = vpop.f32.mrf.mxu1 }
 0x172   :  { %v824_v20 = vpop.f32.mrf.mxu0 }
 0x173   :  { %v912_v53 = vadd.f32 %v824_v20, %v700_v32 }
 0x174   :  { %v826_v7 = vpop.f32.mrf.mxu0 }
 0x175   :  { %v913_v13 = vadd.f32 %v826_v7, %v701_v28 }
 0x176   :  { %v830_v23 = vpop.f32.mrf.mxu0 }
 0x178   :  { %v832_v63 = vpop.f32.mrf.mxu0  ;;  %v901_v31 = vpop.f32.mrf.mxu1 }
 0x179   :  { %v917_v12 = vadd.f32 %v832_v63, %v705_v48  ;;  %v914_v46 = vadd.f32 %v901_v31, %v702_v35 }
 0x17a   :  { %v903_v39 = vpop.f32.mrf.mxu1  ;;  %v995_v2 = vpop.f32.mrf.mxu0 }
 0x17b   :  { %v1083_v56 = vadd.f32 %v995_v2, %v912_v53 }
 0x17c   :  { %v907_v54 = vpop.f32.mrf.mxu1  ;;  %v997_v4 = vpop.f32.mrf.mxu0 }
 0x17d   :  { %v1084_v5 = vadd.f32 %v997_v4, %v913_v13 }
 0x17e   :  { %v4953_v14 = vpop.f32.mrf.mxu1  ;;  %v1001_v62 = vpop.f32.mrf.mxu0 }
 0x17f   :  { %5841 = vst [vmem:[#allocation37_spill] sm:$0xff] %v4953_v14 }
 0x180   :  { %v1072_v3 = vpop.f32.mrf.mxu1  ;;  %v1003_v42 = vpop.f32.mrf.mxu0 }
 0x181   :  { %v1085_v45 = vadd.f32 %v1072_v3, %v914_v46 }
 0x182   :  { %v1074_v27 = vpop.f32.mrf.mxu1  ;;  %v1207_v1 = vpop.f32.mrf.mxu0 }
 0x183   :  { %v1295_v44 = vadd.f32 %v1207_v1, %v1083_v56 }
 0x184   :  { %v4955_v22 = vpop.f32.mrf.mxu1  ;;  %v1209_v49 = vpop.f32.mrf.mxu0 }
 0x185   :  { %5842 = vst [vmem:[#allocation38_spill] sm:$0xff] %v4955_v22  ;;  %v704_v22 = vadd.f32 %v618_v9, %v407_v11  ;;  %v1296_v58 = vadd.f32 %v1209_v49, %v1084_v5 }
 0x186   :  { %v4957_v57 = vpop.f32.mrf.mxu1  ;;  %v1213_v17 = vpop.f32.mrf.mxu0  ;;  %v5848_v48 = vld [vmem:[#allocation37_spill] sm:$0xff] }
 0x187   :  { %5843 = vst [vmem:[#allocation39_spill] sm:$0xff] %v4957_v57  ;;  %v916_v41 = vadd.f32 %v830_v23, %v704_v22 }
 0x188   :  { %v1284_v15 = vpop.f32.mrf.mxu1  ;;  %v1215_v16 = vpop.f32.mrf.mxu0 }
 0x189   :  { %v1087_v26 = vadd.f32 %v1001_v62, %v916_v41 }
 0x18a   :  { %v1286_v29 = vpop.f32.mrf.mxu1 }
 0x18c   :  { %v4959_v8 = vpop.f32.mrf.mxu1  ;;  %v5849_v2 = vld [vmem:[#allocation38_spill] sm:$0xff] }
 0x18d   :  { %5844 = vst [vmem:[#allocation40_spill] sm:$0xff] %v4959_v8 }
 0x18e   :  { %v4961_v30 = vpop.f32.mrf.mxu1 }
 0x18f   :  { %5845 = vst [vmem:[#allocation41_spill] sm:$0xff] %v4961_v30  ;;  %v484_v30 = vadd.f32 %v483_v60, %v323_v51  ;;  %v915_v51 = vadd.f32 %v903_v39, %v703_v19  ;;  %v1088_v60 = vadd.f32 %v1003_v42, %v917_v12 }
 0x191   :  { %v706_v47 = vadd.f32 %v695_v0, %v484_v30  ;;  %v1300_v4 = vadd.f32 %v1215_v16, %v1088_v60  ;;  %v1297_v30 = vadd.f32 %v1284_v15, %v1085_v45 }
 0x192   :  { %v1427_v59 = vpop.f32.mrf.mxu0 }
 0x193   :  { %v918_v28 = vadd.f32 %v907_v54, %v706_v47  ;;  %v1515_v22 = vadd.f32 %v1427_v59, %v1295_v44  ;;  %v5850_v54 = vld [vmem:[#allocation39_spill] sm:$0xff] }
 0x194   :  { %v1429_v50 = vpop.f32.mrf.mxu0 }
 0x195   :  { %v1516_v32 = vadd.f32 %v1429_v50, %v1296_v58  ;;  %v1089_v49 = vadd.f32 %v5849_v2, %v918_v28 }
 0x196   :  { %v1433_v61 = vpop.f32.mrf.mxu0  ;;  %v5852_v63 = vld [vmem:[#allocation41_spill] sm:$0xff] }
 0x198   :  { %v1504_v38 = vpop.f32.mrf.mxu1  ;;  %v1435_v52 = vpop.f32.mrf.mxu0 }
 0x199   :  { %v1520_v42 = vadd.f32 %v1435_v52, %v1300_v4  ;;  %v1517_v3 = vadd.f32 %v1504_v38, %v1297_v30 }
 0x19a   :  { %v1506_v36 = vpop.f32.mrf.mxu1 }
 0x19c   :  { %v4963_v40 = vpop.f32.mrf.mxu1 }
 0x19d   :  { %5846 = vst [vmem:[#allocation42_spill] sm:$0xff] %v4963_v40  ;;  %v486_v40 = vadd.f32 %v485_v34, %v5847_v18  ;;  %v1086_v34 = vadd.f32 %v1074_v27, %v915_v51  ;;  %v5851_v27 = vld [vmem:[#allocation40_spill] sm:$0xff] }
 0x19e   :  { %v4965_v8 = vpop.f32.mrf.mxu1  ;;  %v1301_v20 = vadd.f32 %v5851_v27, %v1089_v49 }
 0x19f   :  { %v707_v21 = vadd.f32 %v697_v6, %v486_v40  ;;  %v1299_v40 = vadd.f32 %v1213_v17, %v1087_v26  ;;  %v1298_v25 = vadd.f32 %v1286_v29, %v1086_v34 }
 0x1a1   :  { %v919_v24 = vadd.f32 %v5848_v48, %v707_v21  ;;  %v1519_v7 = vadd.f32 %v1433_v61, %v1299_v40  ;;  %v1518_v59 = vadd.f32 %v1506_v36, %v1298_v25 }
 0x1a2   :  { %v1639_v55 = vpop.f32.mrf.mxu0 }
 0x1a3   :  { %v1727_v1 = vadd.f32 %v1639_v55, %v1515_v22  ;;  %v1090_v62 = vadd.f32 %v5850_v54, %v919_v24  ;;  %v2018_v54 = vld [vmem:[%s5705_s4 + $0x8] sm:$0xff] }
 0x1a4   :  { %v1641_v57 = vpop.f32.mrf.mxu0  ;;  %v5853_v17 = vld [vmem:[#allocation42_spill] sm:$0xff] }
 0x1a5   :  { %v1728_v9 = vadd.f32 %v1641_v57, %v1516_v32  ;;  %v1302_v31 = vadd.f32 %v5852_v63, %v1090_v62  ;;  %v1521_v29 = vadd.f32 %v5853_v17, %v1301_v20  ;;  %v2017_v62 = vld [vmem:[%s5705_s4] sm:$0xff] }
 0x1a6   :  { %v1645_v43 = vpop.f32.mrf.mxu0  ;;  %v1991_v63 = vld [vmem:[%s5706_s3] sm:$0xff] }
 0x1a7   :  { %v1731_v39 = vadd.f32 %v1645_v43, %v1519_v7  ;;  %v1522_v18 = vadd.f32 %v4965_v8, %v1302_v31 }
 0x1a8   :  { %v1716_v14 = vpop.f32.mrf.mxu1  ;;  %v1647_v11 = vpop.f32.mrf.mxu0 }
 0x1a9   :  { %v1732_v57 = vadd.f32 %v1647_v11, %v1520_v42  ;;  %v1729_v6 = vadd.f32 %v1716_v14, %v1517_v3 }
 0x1aa   :  { %v1718_v37 = vpop.f32.mrf.mxu1 }
 0x1ab   :  { %v1730_v55 = vadd.f32 %v1718_v37, %v1518_v59 }
 0x1ac   :  { %v1722_v10 = vpop.f32.mrf.mxu1 }
 0x1ad   :  { %v1733_v19 = vadd.f32 %v1722_v10, %v1521_v29 }
 0x1ae   :  { %v1724_v16 = vpop.f32.mrf.mxu1 }
 0x1af   :  { %v1734_v41 = vadd.f32 %v1724_v16, %v1522_v18 }
 0x1b2   :  { %v1855_v33 = vpop.f32.mrf.mxu0 }
 0x1b3   :  { %v1943_v23 = vadd.f32 %v1855_v33, %v1727_v1 }
 0x1b4   :  { %v1857_v0 = vpop.f32.mrf.mxu0 }
 0x1b5   :  { %v1944_v50 = vadd.f32 %v1857_v0, %v1728_v9 }
 0x1b6   :  { %v1861_v15 = vpop.f32.mrf.mxu0 }
 0x1b7   :  { %v1951_v35 = vadd.f32 %v1944_v50, %v1943_v23  ;;  %v1947_v5 = vadd.f32 %v1861_v15, %v1731_v39 }
 0x1b8   :  { %v1863_v52 = vpop.f32.mrf.mxu0  ;;  %v1932_v38 = vpop.f32.mrf.mxu1 }
 0x1b9   :  { %v1948_v53 = vadd.f32 %v1863_v52, %v1732_v57  ;;  %v1945_v13 = vadd.f32 %v1932_v38, %v1729_v6  ;;  %v1992_v57 = vld [vmem:[%s5706_s3 + $0x8] sm:$0xff] }
 0x1ba   :  { %v1934_v61 = vpop.f32.mrf.mxu1 }
 0x1bb   :  { %v1952_v36 = vadd.f32 %v1951_v35, %v1945_v13  ;;  %v1946_v47 = vadd.f32 %v1934_v61, %v1730_v55  ;;  %v1956_v12 = vadd.f32 %v1948_v53, %v1947_v5 }
 0x1bc   :  { %v1938_v14 = vpop.f32.mrf.mxu1 }
 0x1bd   :  { %v1949_v46 = vadd.f32 %v1938_v14, %v1733_v19  ;;  %v1953_v56 = vadd.f32 %v1952_v36, %v1946_v47 }
 0x1be   :  { %v1940_v58 = vpop.f32.mrf.mxu1 }
 0x1bf   :  { %v1957_v43 = vadd.f32 %v1956_v12, %v1949_v46  ;;  %v1950_v21 = vadd.f32 %v1940_v58, %v1734_v41  ;;  %1954 = vadd.xlane.f32.xlu1 %v1953_v56 }
 0x1c1   :  { %v1958_v37 = vadd.f32 %v1957_v43, %v1950_v21 }
 0x1c3   :  { %1959 = vadd.xlane.f32.xlu0 %v1958_v37 }
 0x248   :  { %v1955_v51 = vpop.xlane.xlu1 %1954 }
 0x249   :  { %v1961_v11 = vmul.f32 0.001953125, %v1955_v51 }
 0x24b   :  { %v1963_v60 = vsub.f32 %v1943_v23, %v1961_v11  ;;  %v1964_v8 = vsub.f32 %v1944_v50, %v1961_v11  ;;  %v1965_v22 = vsub.f32 %v1945_v13, %v1961_v11  ;;  %v1966_v40 = vsub.f32 %v1946_v47, %v1961_v11 }
 0x24c   :  { %v1960_v45 = vpop.xlane.xlu0 %1959  ;;  %v4119_v50 = vmov 0  }
 0x24d   :  { %v1962_v44 = vmul.f32 0.001953125, %v1960_v45  ;;  %v1971_v32 = vmul.f32 %v1963_v60, %v1963_v60  ;;  %v1972_v10 = vmul.f32 %v1964_v8, %v1964_v8  ;;  %v1973_v25 = vmul.f32 %v1965_v22, %v1965_v22  ;;  %4093 = vset.pattern.permute.xlu1 %v4119_v50  ;;  %4092 = vset.pattern.permute.xlu0 %v4119_v50 }
 0x24e   :  { %v1974_v3 = vmul.f32 %v1966_v40, %v1966_v40  ;;  %2026 = vperm.xlu1 %4093, %v2018_v54  }
 0x24f   :  { %v4975_v28 = vsub.f32 %v1947_v5, %v1962_v44  ;;  %v4977_v26 = vsub.f32 %v1948_v53, %v1962_v44  ;;  %v1969_v34 = vsub.f32 %v1949_v46, %v1962_v44  ;;  %v4979_v33 = vsub.f32 %v1950_v21, %v1962_v44 }
 0x250   :  { %v1979_v24 = vadd.f32 %v1972_v10, %v1971_v32 }
 0x251   :  { %v1975_v4 = vmul.f32 %v4975_v28, %v4975_v28  ;;  %v1976_v30 = vmul.f32 %v4977_v26, %v4977_v26  ;;  %v1977_v9 = vmul.f32 %v1969_v34, %v1969_v34  ;;  %v1978_v2 = vmul.f32 %v4979_v33, %v4979_v33 }
 0x252   :  { %v1980_v42 = vadd.f32 %v1979_v24, %v1973_v25  ;;  %2021 = vperm.xlu1 %4093, %v2017_v62  }
 0x253   :  { %v1984_v48 = vadd.f32 %v1976_v30, %v1975_v4 }
 0x254   :  { %v1981_v1 = vadd.f32 %v1980_v42, %v1974_v3 }
 0x255   :  { %v1985_v49 = vadd.f32 %v1984_v48, %v1977_v9 }
 0x257   :  { %v1986_v0 = vadd.f32 %v1985_v49, %v1978_v2 }
 0x259   :  { %1987 = vadd.xlane.f32.xlu0 %v1986_v0 }
 0x25d   :  { %1982 = vadd.xlane.f32.xlu0 %v1981_v1 }
 0x2c9   :  { %v2027_v29 = vpop.permute.xlu1 %2026 }
 0x2cd   :  { %v2022_v55 = vpop.permute.xlu1 %2021 }
 0x2e2   :  { %v1988_v27 = vpop.xlane.xlu0 %1987 }
 0x2e3   :  { %v1990_v20 = vmul.f32 0.001953125, %v1988_v27 }
 0x2e5   :  { %v1994_v7 = vadd.f32 1e-05, %v1990_v20 }
 0x2e6   :  { %v1983_v16 = vpop.xlane.xlu0 %1982 }
 0x2e7   :  { %4094 = vrsqrt.f32 %v1994_v7  ;;  %v1989_v15 = vmul.f32 0.001953125, %v1983_v16 }
 0x2e9   :  { %v1993_v59 = vadd.f32 1e-05, %v1989_v15 }
 0x2eb   :  { %4096 = vrsqrt.f32 %v1993_v59 }
 0x2f4   :  { %v4095_v6 = vpop.eup %4094 }
 0x2f5   :  { %v1998_v23 = vmul.f32 %v4095_v6, %v1992_v57 }
 0x2f7   :  { %2006 = vperm.xlu1 %4093, %v1998_v23   ;;  %v5854_v23 = vld [vmem:[#allocation3_spill] sm:$0xff] }
 0x2f8   :  { %v4097_v31 = vpop.eup %4096  ;;  %vm5855_vm0 = vcmp.lt.s32.totalorder %v5854_v23, 16  ;;  %vm5866_vm5 = vcmp.lt.s32.totalorder %v5854_v23, 17  ;;  %v4073_v23 = vld [vmem:[%s5707_s2 + $0x88] sm:$0xff] }
 0x2f9   :  { %v1997_v17 = vmul.f32 %v4097_v31, %v1991_v63  ;;  %v5856_v31 = vld [vmem:[#allocation4_spill] sm:$0xff]  ;;  %vm5857_vm8 = vmmov %vm5855_vm0 }
 0x2fa   :  { %vm5858_vm2 = vmmov %vm5855_vm0 }
 0x2fb   :  { %2001 = vperm.xlu0 %4092, %v1997_v17   ;;  %vm5859_vm10 = vmmov %vm5855_vm0 }
 0x2fc   :  { %vm5860_vm13 = vmmov %vm5855_vm0 }
 0x2fd   :  { %vm5861_vm12 = vmmov %vm5855_vm0 }
 0x2fe   :  { %vm5862_vm14 = vmmov %vm5855_vm0 }
 0x2ff   :  { %vm5863_vm7 = vmmov %vm5855_vm0 }
 0x372   :  { %v2007_v36 = vpop.permute.xlu1 %2006 }
 0x373   :  { %v2015_v47 = vmul.f32 %v2007_v36, %v1969_v34  ;;  %v2013_v12 = vmul.f32 %v2007_v36, %v4975_v28  ;;  %v2016_v58 = vmul.f32 %v2007_v36, %v4979_v33 }
 0x375   :  { %v2035_v46 = vadd.f32 %v2027_v29, %v2015_v47  ;;  %v2033_v43 = vadd.f32 %v2027_v29, %v2013_v12  ;;  %v2036_v37 = vadd.f32 %v2027_v29, %v2016_v58  ;;  %v5865_v47 = vld [vmem:[#allocation6_spill] sm:$0xff]  ;;  %v5867_v58 = vld [vmem:[#allocation7_spill] sm:$0xff] }
 0x376   :  { %v2002_v39 = vpop.permute.xlu0 %2001 }
 0x377   :  { %v2009_v52 = vmul.f32 %v2002_v39, %v1963_v60  ;;  %v2010_v38 = vmul.f32 %v2002_v39, %v1964_v8  ;;  %v2012_v13 = vmul.f32 %v2002_v39, %v1966_v40  ;;  %v2011_v19 = vmul.f32 %v2002_v39, %v1965_v22 }
 0x378   :  { %v5025_v21 = vmax.f32 %v2035_v46, 0.0  ;;  %v5031_v51 = vmax.f32 %v2033_v43, 0.0  ;;  %v5037_v11 = vmax.f32 %v2036_v37, 0.0  ;;  %v2014_v60 = vmul.f32 %v2007_v36, %v4977_v26 }
 0x379   :  { %v2029_v35 = vadd.f32 %v2022_v55, %v2009_v52  ;;  %v2030_v53 = vadd.f32 %v2022_v55, %v2010_v38  ;;  %v2032_v5 = vadd.f32 %v2022_v55, %v2012_v13  ;;  %v2031_v14 = vadd.f32 %v2022_v55, %v2011_v19 }
 0x37a   :  { %v2034_v8 = vadd.f32 %v2027_v29, %v2014_v60 }
 0x37b   :  { %v4999_v18 = vmax.f32 %v2029_v35, 0.0  ;;  %v5001_v61 = vmax.f32 %v2030_v53, 0.0  ;;  %v5011_v41 = vmax.f32 %v2032_v5, 0.0  ;;  %v5018_v56 = vmax.f32 %v2031_v14, 0.0  ;;  %v5864_v5 = vld [vmem:[#allocation5_spill] sm:$0xff] }
 0x37c   :  { %v5076_v45 = vmax.f32 %v2034_v8, 0.0 }
 0x37d   :  { %2049 = vrot.lane.b32.xlu0 %v5001_v61, %s4112_s18  ;;  %2079 = vrot.lane.b32.xlu1 %v4999_v18, %s4111_s28 }
 0x381   :  { %2438 = vrot.lane.b32.xlu0 %v5001_v61, %s4113_s19  ;;  %2083 = vrot.lane.b32.xlu1 %v5001_v61, %s4111_s28 }
 0x385   :  { %2641 = vrot.lane.b32.xlu0 %v5001_v61, %s4114_s20  ;;  %2091 = vrot.lane.b32.xlu1 %v5011_v41, %s4111_s28 }
 0x389   :  { %3019 = vrot.lane.b32.xlu0 %v5018_v56, %s4115_s21  ;;  %2087 = vrot.lane.b32.xlu1 %v5018_v56, %s4111_s28 }
 0x38d   :  { %2089 = vrot.lane.b32.xlu0 %v5025_v21, %s4111_s28  ;;  %2045 = vrot.lane.b32.xlu1 %v4999_v18, %s4112_s18 }
 0x391   :  { %2047 = vrot.lane.b32.xlu0 %v5031_v51, %s4112_s18  ;;  %2057 = vrot.lane.b32.xlu1 %v5011_v41, %s4112_s18 }
 0x395   :  { %2059 = vrot.lane.b32.xlu0 %v5037_v11, %s4112_s18  ;;  %2053 = vrot.lane.b32.xlu1 %v5018_v56, %s4112_s18 }
 0x399   :  { %2055 = vrot.lane.b32.xlu0 %v5025_v21, %s4112_s18  ;;  %2434 = vrot.lane.b32.xlu1 %v4999_v18, %s4113_s19 }
 0x39d   :  { %2436 = vrot.lane.b32.xlu0 %v5031_v51, %s4113_s19  ;;  %2446 = vrot.lane.b32.xlu1 %v5011_v41, %s4113_s19 }
 0x3a1   :  { %3222 = vrot.lane.b32.xlu0 %v5018_v56, %s4116_s22  ;;  %2442 = vrot.lane.b32.xlu1 %v5018_v56, %s4113_s19 }
 0x3a5   :  { %2448 = vrot.lane.b32.xlu0 %v5037_v11, %s4113_s19  ;;  %2637 = vrot.lane.b32.xlu1 %v4999_v18, %s4114_s20 }
 0x3a9   :  { %2444 = vrot.lane.b32.xlu0 %v5025_v21, %s4113_s19  ;;  %2649 = vrot.lane.b32.xlu1 %v5011_v41, %s4114_s20 }
 0x3ad   :  { %2639 = vrot.lane.b32.xlu0 %v5031_v51, %s4114_s20  ;;  %2645 = vrot.lane.b32.xlu1 %v5018_v56, %s4114_s20 }
 0x3b1   :  { %3425 = vrot.lane.b32.xlu0 %v5018_v56, %s4117_s23  ;;  %3015 = vrot.lane.b32.xlu1 %v5001_v61, %s4115_s21 }
 0x3b5   :  { %2651 = vrot.lane.b32.xlu0 %v5037_v11, %s4114_s20  ;;  %2081 = vrot.lane.b32.xlu1 %v5031_v51, %s4111_s28 }
 0x3b9   :  { %2647 = vrot.lane.b32.xlu0 %v5025_v21, %s4114_s20  ;;  %2085 = vrot.lane.b32.xlu1 %v5076_v45, %s4111_s28 }
 0x3bd   :  { %3017 = vrot.lane.b32.xlu0 %v5076_v45, %s4115_s21  ;;  %2093 = vrot.lane.b32.xlu1 %v5037_v11, %s4111_s28 }
 0x3c1   :  { %3013 = vrot.lane.b32.xlu0 %v5031_v51, %s4115_s21  ;;  %3011 = vrot.lane.b32.xlu1 %v4999_v18, %s4115_s21 }
 0x3c5   :  { %3025 = vrot.lane.b32.xlu0 %v5037_v11, %s4115_s21  ;;  %2051 = vrot.lane.b32.xlu1 %v5076_v45, %s4112_s18 }
 0x3c9   :  { %3220 = vrot.lane.b32.xlu0 %v5076_v45, %s4116_s22  ;;  %3023 = vrot.lane.b32.xlu1 %v5011_v41, %s4115_s21 }
 0x3cd   :  { %3216 = vrot.lane.b32.xlu0 %v5031_v51, %s4116_s22  ;;  %2440 = vrot.lane.b32.xlu1 %v5076_v45, %s4113_s19 }
 0x3d1   :  { %3228 = vrot.lane.b32.xlu0 %v5037_v11, %s4116_s22  ;;  %3218 = vrot.lane.b32.xlu1 %v5001_v61, %s4116_s22 }
 0x3d5   :  { %3423 = vrot.lane.b32.xlu0 %v5076_v45, %s4117_s23  ;;  %2643 = vrot.lane.b32.xlu1 %v5076_v45, %s4114_s20 }
 0x3d9   :  { %3628 = vrot.lane.b32.xlu0 %v5018_v56, %s4118_s24  ;;  %3214 = vrot.lane.b32.xlu1 %v4999_v18, %s4116_s22 }
 0x3dd   :  { %3419 = vrot.lane.b32.xlu0 %v5031_v51, %s4117_s23  ;;  %3226 = vrot.lane.b32.xlu1 %v5011_v41, %s4116_s22 }
 0x3e1   :  { %3431 = vrot.lane.b32.xlu0 %v5037_v11, %s4117_s23  ;;  %3421 = vrot.lane.b32.xlu1 %v5001_v61, %s4117_s23 }
 0x3e5   :  { %3626 = vrot.lane.b32.xlu0 %v5076_v45, %s4118_s24  ;;  %3021 = vrot.lane.b32.xlu1 %v5025_v21, %s4115_s21 }
 0x3e9   :  { %3622 = vrot.lane.b32.xlu0 %v5031_v51, %s4118_s24  ;;  %3417 = vrot.lane.b32.xlu1 %v4999_v18, %s4117_s23 }
 0x3ed   :  { %3634 = vrot.lane.b32.xlu0 %v5037_v11, %s4118_s24  ;;  %3224 = vrot.lane.b32.xlu1 %v5025_v21, %s4116_s22 }
 0x3ef   :  { %v5134_v44 = vpop.permute.xlu0 %2049  ;;  %v2080_v32 = vpop.permute.xlu1 %2079 }
 0x3f1   :  { %3429 = vrot.lane.b32.xlu1 %v5011_v41, %s4117_s23 }
 0x3f3   :  { %v5138_v28 = vpop.permute.xlu0 %2438  ;;  %v2084_v26 = vpop.permute.xlu1 %2083 }
 0x3f4   :  { %v2099_v29 = vsel %vm5857_vm8, %v2080_v32, %v2084_v26 }
 0x3f5   :  { %3427 = vrot.lane.b32.xlu1 %v5025_v21, %s4117_s23  ;;  %v2104_v12 = vmul.f32 %v5856_v31, %v2099_v29 }
 0x3f7   :  { %v5142_v34 = vpop.permute.xlu0 %2641  ;;  %v2092_v10 = vpop.permute.xlu1 %2091 }
 0x3f8   :  { %v2101_v55 = vsel %vm5859_vm10, %v2092_v10, %v2080_v32 }
 0x3f9   :  { %3624 = vrot.lane.b32.xlu1 %v5001_v61, %s4118_s24  ;;  %v2103_v37 = vmul.f32 %v5864_v5, %v2101_v55 }
 0x3fb   :  { %v5146_v33 = vpop.permute.xlu0 %3019  ;;  %v2088_v4 = vpop.permute.xlu1 %2087 }
 0x3fc   :  { %v2095_v35 = vsel %vm5860_vm13, %v2088_v4, %v2092_v10  ;;  %v2097_v19 = vsel %vm5863_vm7, %v2084_v26, %v2088_v4  ;;  %v4026_v26 = vld [vmem:[%s5707_s2 + $0x10] sm:$0xff]  ;;  %v5868_v4 = vld [vmem:[#allocation11_spill] sm:$0xff] }
 0x3fd   :  { %3630 = vrot.lane.b32.xlu1 %v5025_v21, %s4118_s24  ;;  %v2106_v60 = vmul.f32 %v5865_v47, %v2095_v35  ;;  %v2105_v10 = vmul.f32 %v5867_v58, %v2097_v19 }
 0x3ff   :  { %v2090_v30 = vpop.permute.xlu0 %2089  ;;  %v5150_v22 = vpop.permute.xlu1 %2045 }
 0x401   :  { %3620 = vrot.lane.b32.xlu1 %v4999_v18, %s4118_s24 }
 0x403   :  { %v5154_v9 = vpop.permute.xlu0 %2047  ;;  %v5156_v48 = vpop.permute.xlu1 %2057 }
 0x405   :  { %3632 = vrot.lane.b32.xlu1 %v5011_v41, %s4118_s24 }
 0x407   :  { %v2060_v24 = vpop.permute.xlu0 %2059  ;;  %v5160_v2 = vpop.permute.xlu1 %2053 }
 0x40b   :  { %v2056_v49 = vpop.permute.xlu0 %2055  ;;  %v5162_v40 = vpop.permute.xlu1 %2434 }
 0x40c   :  { %v2062_v46 = vsel %vm5866_vm5, %v2056_v49, %v2060_v24 }
 0x40f   :  { %v5164_v25 = vpop.permute.xlu0 %2436  ;;  %v5166_v0 = vpop.permute.xlu1 %2446 }
 0x413   :  { %v5168_v42 = vpop.permute.xlu0 %3222  ;;  %v5170_v3 = vpop.permute.xlu1 %2442 }
 0x417   :  { %v5172_v1 = vpop.permute.xlu0 %2448  ;;  %v5174_v50 = vpop.permute.xlu1 %2637 }
 0x41b   :  { %v5176_v54 = vpop.permute.xlu0 %2444  ;;  %v5178_v62 = vpop.permute.xlu1 %2649 }
 0x41f   :  { %v5180_v27 = vpop.permute.xlu0 %2639  ;;  %v5182_v20 = vpop.permute.xlu1 %2645 }
 0x423   :  { %v5184_v7 = vpop.permute.xlu0 %3425  ;;  %v5186_v16 = vpop.permute.xlu1 %3015 }
 0x427   :  { %v5188_v15 = vpop.permute.xlu0 %2651  ;;  %v2082_v59 = vpop.permute.xlu1 %2081 }
 0x42b   :  { %v5190_v57 = vpop.permute.xlu0 %2647  ;;  %v2086_v6 = vpop.permute.xlu1 %2085 }
 0x42c   :  { %v2100_v63 = vsel %vm5855_vm0, %v2082_v59, %v2086_v6  ;;  %v2098_v39 = vsel %vm5858_vm2, %v2086_v6, %v2090_v30  ;;  %vm5869_vm0 = vmmov %vm5866_vm5 }
 0x42d   :  { %v2108_v17 = vmul.f32 %v5856_v31, %v2100_v63  ;;  %v2109_v43 = vmul.f32 %v5867_v58, %v2098_v39  ;;  %vm5870_vm8 = vmmov %vm5869_vm0 }
 0x42e   :  { %v2068_v6 = vsel %vm5870_vm8, %v2060_v24, %v5154_v9  ;;  %vm5871_vm2 = vmmov %vm5869_vm0 }
 0x42f   :  { %v5199_v52 = vpop.permute.xlu0 %3017  ;;  %2148 = vmatprep.subr.mxu0 %v2108_v17  ;;  %v2094_v38 = vpop.permute.xlu1 %2093  ;;  %v4027_v17 = vld [vmem:[%s5707_s2 + $0x18] sm:$0xff]  ;;  %v2061_v29 = vsel %vm5871_vm2, %v5160_v2, %v5156_v48  ;;  %vm5872_vm10 = vmmov %vm5869_vm0 }
 0x430   :  { %v2096_v53 = vsel %vm5861_vm12, %v2090_v30, %v2094_v38  ;;  %v2102_v13 = vsel %vm5862_vm14, %v2094_v38, %v2082_v59  ;;  %v2076_v30 = vmul.f32 %v5868_v4, %v2062_v46  ;;  %v2065_v59 = vsel %vm5869_vm0, %v5150_v22, %v5134_v44  ;;  %vm5873_vm13 = vmmov %vm5869_vm0  ;;  %v5880_v46 = vld [vmem:[#allocation15_spill] sm:$0xff] }
 0x431   :  { %v2107_v36 = vmul.f32 %v5864_v5, %v2102_v13  ;;  %v2110_v14 = vmul.f32 %v5865_v47, %v2096_v53  ;;  %v5874_v38 = vmov 0.0   ;;  %vm5875_vm12 = vmmov %vm5869_vm0  ;;  %v5877_v53 = vld [vmem:[#allocation8_spill] sm:$0xff]  ;;  %v5878_v13 = vld [vmem:[#allocation10_spill] sm:$0xff]  ;;  %v2072_v47 = vmul.f32 %v5868_v4, %v2061_v29 }
 0x432   :  { %v2067_v55 = vsel %vm5875_vm12, %v5156_v48, %v5150_v22  ;;  %vm5876_vm14 = vmmov %vm5869_vm0  ;;  %v5879_v5 = vld [vmem:[#allocation9_spill] sm:$0xff]  ;;  %v2451_v22 = vsel %vm504_vm6, %v5176_v54, %v5172_v1 }
 0x433   :  { %v5219_v8 = vpop.permute.xlu0 %3013  ;;  %2149 = vmatpush1.msra.mxu0 %v2107_v36  ;;  %2225 = vmatprep.subr.mxu1 %v2110_v14  ;;  %v5221_v32 = vpop.permute.xlu1 %3011  ;;  %v2063_v35 = vsel %vm5876_vm14, %v5134_v44, %v5160_v2  ;;  %v2070_v36 = vmul.f32 %v5877_v53, %v2065_v59  ;;  %v2069_v2 = vmul.f32 %v5879_v5, %v2067_v55 }
 0x434   :  { %2150 = vmatprep.subr.mxu0 %v2104_v12  ;;  %2226 = vmatpush1.msra.mxu1 %v2109_v43  ;;  %v2071_v14 = vmul.f32 %v5878_v13, %v2063_v35  ;;  %v2077_v12 = vld [vmem:[%s5707_s2] sm:$0xff]  ;;  %v2465_v58 = vmul.f32 %v5880_v46, %v2451_v22  ;;  %v2454_v43 = vsel %vm504_vm6, %v5162_v40, %v5138_v28 }
 0x435   :  { %2151 = vmatpush1.msra.mxu0 %v2103_v37  ;;  %2227 = vmatprep.subr.mxu1 %v2106_v60  ;;  %v2450_v37 = vsel %vm504_vm6, %v5170_v3, %v5166_v0  ;;  %v2452_v59 = vsel %vm504_vm6, %v5138_v28, %v5170_v3  ;;  %v5883_v28 = vld [vmem:[#allocation13_spill] sm:$0xff] }
 0x436   :  { %2228 = vmatpush1.msra.mxu1 %v2105_v10  ;;  %4028 = vmatmul.mubr.msk.f32.vlgmr.msra.gmra.mxu0 %vm167_vm11, %v4026_v26  ;;  %v2457_v10 = vsel %vm504_vm6, %v5172_v1, %v5164_v25  ;;  %v2461_v29 = vmul.f32 %v5880_v46, %v2450_v37  ;;  %v5886_v46 = vld [vmem:[#allocation18_spill] sm:$0xff] }
 0x437   :  { %v5236_v63 = vpop.permute.xlu0 %3025  ;;  %4030 = vmatmul.mubr.msk.f32.vlgmr.msra.gmra.mxu1 %vm167_vm11, %v4026_v26  ;;  %2385 = vmatprep.subr.mxu1 %v2076_v30  ;;  %v2052_v31 = vpop.permute.xlu1 %2051  ;;  %v2462_v3 = vmul.f32 %v5883_v28, %v2457_v10 }
 0x438   :  { %v2064_v39 = vsel %vm5872_vm10, %v2052_v31, %v2056_v49  ;;  %v2066_v24 = vsel %vm5873_vm13, %v5154_v9, %v2052_v31  ;;  %2190 = vmatprep.mubr.f32.mxu0 %v5874_v38  ;;  %2267 = vmatprep.mubr.f32.mxu1 %v5874_v38  ;;  %v2073_v9 = vmul.f32 %v5879_v5, %v2068_v6  ;;  %v5881_v6 = vld [vmem:[#allocation12_spill] sm:$0xff]  ;;  %v5882_v31 = vld [vmem:[#allocation14_spill] sm:$0xff] }
 0x439   :  { %v2074_v49 = vmul.f32 %v5877_v53, %v2066_v24  ;;  %v2075_v19 = vmul.f32 %v5878_v13, %v2064_v39  ;;  %v2654_v39 = vsel %vm724_vm9, %v5190_v57, %v5188_v15  ;;  %v2459_v35 = vmul.f32 %v5881_v6, %v2454_v43  ;;  %v5884_v53 = vld [vmem:[#allocation19_spill] sm:$0xff]  ;;  %v5887_v43 = vld [vmem:[#allocation17_spill] sm:$0xff] }
 0x43a   :  { %4029 = vmatmul.mubr.msk.f32.gmra.mxu0 %vm167_vm11, %v4027_v17  ;;  %v4036_v13 = vld [vmem:[%s5707_s2 + $0x20] sm:$0xff]  ;;  %v2660_v5 = vsel %vm724_vm9, %v5188_v15, %v5180_v27 }
 0x43b   :  { %v5271_v48 = vpop.permute.xlu0 %3220  ;;  %4031 = vmatmul.mubr.msk.f32.gmra.mxu1 %vm167_vm11, %v4027_v17  ;;  %2308 = vmatprep.subr.mxu0 %v2074_v49  ;;  %v5274_v44 = vpop.permute.xlu1 %3023  ;;  %v2668_v49 = vmul.f32 %v5884_v53, %v2654_v39  ;;  %v2665_v37 = vmul.f32 %v5887_v43, %v2660_v5 }
 0x43c   :  { %2386 = vmatpush1.msra.mxu1 %v2075_v19  ;;  %2309 = vmatpush1.msra.mxu0 %v2073_v9  ;;  %v2653_v19 = vsel %vm724_vm9, %v5182_v20, %v5178_v62 }
 0x43d   :  { %2387 = vmatprep.subr.mxu1 %v2072_v47  ;;  %2310 = vmatprep.subr.mxu0 %v2070_v36  ;;  %v2657_v47 = vsel %vm724_vm9, %v5174_v50, %v5142_v34 }
 0x43e   :  { %2388 = vmatpush1.msra.mxu1 %v2071_v14  ;;  %2311 = vmatpush1.msra.mxu0 %v2069_v2  ;;  %v2655_v2 = vsel %vm724_vm9, %v5142_v34, %v5182_v20  ;;  %v5885_v14 = vld [vmem:[#allocation16_spill] sm:$0xff] }
 0x43f   :  { %2344 = vmatprep.mubr.f32.mxu0 %v5874_v38  ;;  %2421 = vmatprep.mubr.f32.mxu1 %v5874_v38  ;;  %v5292_v60 = vpop.permute.xlu0 %3216  ;;  %v2441_v26 = vpop.permute.xlu1 %2440  ;;  %v4037_v34 = vld [vmem:[%s5707_s2 + $0x28] sm:$0xff] }
 0x440   :  { %2580 = vmatprep.subr.mxu1 %v2465_v58  ;;  %4032 = vmatmul.mubr.msk.f32.vlgmr.msra.gmra.mxu0 %vm167_vm11, %v2077_v12  ;;  %v2453_v4 = vsel %vm504_vm6, %v2441_v26, %v5176_v54  ;;  %v2455_v30 = vsel %vm504_vm6, %v5164_v25, %v2441_v26  ;;  %v2078_v54 = vld [vmem:[%s5707_s2 + $0x8] sm:$0xff]  ;;  %v2456_v25 = vsel %vm504_vm6, %v5166_v0, %v5162_v40 }
 0x441   :  { %4034 = vmatmul.mubr.msk.f32.vlgmr.msra.gmra.mxu1 %vm167_vm11, %v2077_v12  ;;  %v2463_v1 = vmul.f32 %v5881_v6, %v2455_v30  ;;  %v2464_v17 = vmul.f32 %v5882_v31, %v2453_v4  ;;  %2350 = vmatprep.mubr.f32.mxu0 %v5874_v38  ;;  %v2460_v40 = vmul.f32 %v5882_v31, %v2452_v59  ;;  %v4042_v4 = vld [vmem:[%s5707_s2 + $0x30] sm:$0xff] }
 0x442   :  { %2427 = vmatprep.mubr.f32.mxu1 %v5874_v38  ;;  %v2458_v0 = vmul.f32 %v5883_v28, %v2456_v25  ;;  %v2662_v26 = vmul.f32 %v5885_v14, %v2657_v47  ;;  %v3034_v59 = vsel %vm1107_vm1, %v5236_v63, %v5219_v8 }
 0x443   :  { %v5327_v24 = vpop.permute.xlu0 %3228  ;;  %2503 = vmatprep.subr.mxu0 %v2463_v1  ;;  %2581 = vmatpush1.msra.mxu1 %v2464_v17  ;;  %v5329_v55 = vpop.permute.xlu1 %3218  ;;  %v5888_v1 = vld [vmem:[#allocation23_spill] sm:$0xff]  ;;  %v4043_v17 = vld [vmem:[%s5707_s2 + $0x38] sm:$0xff] }
 0x444   :  { %4033 = vmatmul.mubr.msk.f32.gmra.mxu0 %vm167_vm11, %v2078_v54  ;;  %2582 = vmatprep.subr.mxu1 %v2461_v29  ;;  %v3042_v31 = vmul.f32 %v5888_v1, %v3034_v59  ;;  %v5890_v29 = vld [vmem:[#allocation22_spill] sm:$0xff]  ;;  %v4060_v59 = vld [vmem:[%s5707_s2 + $0x60] sm:$0xff] }
 0x445   :  { %4035 = vmatmul.mubr.msk.f32.gmra.mxu1 %vm167_vm11, %v2078_v54  ;;  %2504 = vmatpush1.msra.mxu0 %v2462_v3  ;;  %v5889_v54 = vld [vmem:[#allocation20_spill] sm:$0xff]  ;;  %v3027_v3 = vsel %vm1107_vm1, %v5146_v33, %v5274_v44 }
 0x446   :  { %2505 = vmatprep.subr.mxu0 %v2459_v35  ;;  %2583 = vmatpush1.msra.mxu1 %v2460_v40  ;;  %v3031_v35 = vsel %vm1107_vm1, %v5221_v32, %v5186_v16 }
 0x447   :  { %2506 = vmatpush1.msra.mxu0 %v2458_v0  ;;  %2539 = vmatprep.mubr.f32.mxu0 %v5874_v38  ;;  %v5349_v9 = vpop.permute.xlu0 %3423  ;;  %v2644_v36 = vpop.permute.xlu1 %2643 }
 0x448   :  { %2616 = vmatprep.mubr.f32.mxu1 %v5874_v38  ;;  %2783 = vmatprep.subr.mxu1 %v2668_v49  ;;  %v2656_v22 = vsel %vm724_vm9, %v2644_v36, %v5190_v57  ;;  %v2658_v15 = vsel %vm724_vm9, %v5180_v27, %v2644_v36  ;;  %v2659_v57 = vsel %vm724_vm9, %v5178_v62, %v5174_v50  ;;  %v4054_v36 = vld [vmem:[%s5707_s2 + $0x50] sm:$0xff] }
 0x449   :  { %4038 = vmatmul.mubr.msk.f32.vlgmr.msra.gmra.mxu0 %vm167_vm11, %v4036_v13  ;;  %4040 = vmatmul.mubr.msk.f32.vlgmr.msra.gmra.mxu1 %vm167_vm11, %v4036_v13  ;;  %v2666_v12 = vmul.f32 %v5885_v14, %v2658_v15  ;;  %v2667_v58 = vmul.f32 %v5886_v46, %v2656_v22  ;;  %v2664_v27 = vmul.f32 %v5884_v53, %v2653_v19  ;;  %v5892_v19 = vld [vmem:[#allocation27_spill] sm:$0xff]  ;;  %v5893_v15 = vld [vmem:[#allocation24_spill] sm:$0xff]  ;;  %v5894_v14 = vld [vmem:[#allocation26_spill] sm:$0xff] }
 0x44a   :  { %2545 = vmatprep.mubr.f32.mxu0 %v5874_v38  ;;  %2622 = vmatprep.mubr.f32.mxu1 %v5874_v38  ;;  %v2663_v50 = vmul.f32 %v5886_v46, %v2655_v2  ;;  %v2661_v10 = vmul.f32 %v5887_v43, %v2659_v57  ;;  %v3235_v49 = vsel %vm1319_vm3, %v5292_v60, %v5271_v48 }
 0x44b   :  { %2706 = vmatprep.subr.mxu0 %v2666_v12  ;;  %2784 = vmatpush1.msra.mxu1 %v2667_v58  ;;  %v5381_v20 = vpop.permute.xlu1 %3214  ;;  %v5385_v62 = vpop.permute.xlu0 %3628  ;;  %v5895_v58 = vld [vmem:[#allocation25_spill] sm:$0xff] }
 0x44c   :  { %2707 = vmatpush1.msra.mxu0 %v2665_v37  ;;  %2785 = vmatprep.subr.mxu1 %v2664_v27  ;;  %v3242_v57 = vmul.f32 %v5895_v58, %v3235_v49  ;;  %v3234_v27 = vsel %vm1319_vm3, %v5381_v20, %v5329_v55 }
 0x44d   :  { %4039 = vmatmul.mubr.msk.f32.gmra.mxu0 %vm167_vm11, %v4037_v34  ;;  %4041 = vmatmul.mubr.msk.f32.gmra.mxu1 %vm167_vm11, %v4037_v34 }
 0x44e   :  { %2708 = vmatprep.subr.mxu0 %v2662_v26  ;;  %2786 = vmatpush1.msra.mxu1 %v2663_v50  ;;  %v3238_v26 = vmul.f32 %v5895_v58, %v3234_v27 }
 0x44f   :  { %2709 = vmatpush1.msra.mxu0 %v2661_v10  ;;  %2742 = vmatprep.mubr.f32.mxu0 %v5874_v38  ;;  %v5394_v30 = vpop.permute.xlu1 %3226  ;;  %v5404_v6 = vpop.permute.xlu0 %3419 }
 0x450   :  { %2819 = vmatprep.mubr.f32.mxu1 %v5874_v38  ;;  %2954 = vmatprep.subr.mxu1 %v5037_v11  ;;  %v3236_v22 = vsel %vm1319_vm3, %v5394_v30, %v5381_v20  ;;  %v3438_v50 = vsel %vm1539_vm15, %v5404_v6, %v5349_v9 }
 0x451   :  { %4044 = vmatmul.mubr.msk.f32.vlgmr.msra.gmra.mxu0 %vm167_vm11, %v4042_v4  ;;  %4046 = vmatmul.mubr.msk.f32.vlgmr.msra.gmra.mxu1 %vm167_vm11, %v4042_v4  ;;  %v3241_v43 = vmul.f32 %v5892_v19, %v3236_v22  ;;  %v5896_v4 = vld [vmem:[#allocation31_spill] sm:$0xff] }
 0x452   :  { %2877 = vmatprep.subr.mxu0 %v5076_v45  ;;  %2955 = vmatpush1.msra.mxu1 %v5025_v21  ;;  %v3033_v45 = vsel %vm1107_vm1, %v5274_v44, %v5221_v32  ;;  %v3237_v44 = vsel %vm1319_vm3, %v5327_v24, %v5292_v60 }
 0x453   :  { %2878 = vmatpush1.msra.mxu0 %v5031_v51  ;;  %2956 = vmatprep.subr.mxu1 %v5011_v41  ;;  %v5410_v11 = vpop.permute.xlu1 %3421  ;;  %v5423_v21 = vpop.permute.xlu0 %3431  ;;  %v3032_v51 = vsel %vm1107_vm1, %v5219_v8, %v5199_v52  ;;  %v5891_v8 = vld [vmem:[#allocation21_spill] sm:$0xff]  ;;  %v3038_v40 = vmul.f32 %v5888_v1, %v3033_v45  ;;  %v3245_v5 = vmul.f32 %v5892_v19, %v3237_v44 }
 0x454   :  { %2879 = vmatprep.subr.mxu0 %v5001_v61  ;;  %2957 = vmatpush1.msra.mxu1 %v5018_v56  ;;  %v4048_v61 = vld [vmem:[%s5707_s2 + $0x40] sm:$0xff]  ;;  %v3039_v39 = vmul.f32 %v5891_v8, %v3032_v51  ;;  %v3035_v53 = vmul.f32 %v5891_v8, %v3031_v35  ;;  %v3440_v34 = vsel %vm1539_vm15, %v5423_v21, %v5404_v6  ;;  %v5899_v45 = vld [vmem:[#allocation29_spill] sm:$0xff] }
 0x455   :  { %2748 = vmatprep.mubr.f32.mxu0 %v5874_v38  ;;  %2825 = vmatprep.mubr.f32.mxu1 %v5874_v38  ;;  %v5900_v8 = vld [vmem:[#allocation35_spill] sm:$0xff]  ;;  %v4066_v35 = vld [vmem:[%s5707_s2 + $0x70] sm:$0xff] }
 0x456   :  { %2880 = vmatpush1.msra.mxu0 %v4999_v18  ;;  %3157 = vmatprep.subr.mxu1 %v3042_v31 }
 0x457   :  { %4045 = vmatmul.mubr.msk.f32.gmra.mxu0 %vm167_vm11, %v4043_v17  ;;  %4047 = vmatmul.mubr.msk.f32.gmra.mxu1 %vm167_vm11, %v4043_v17  ;;  %v3022_v41 = vpop.permute.xlu1 %3021  ;;  %v5475_v32 = vpop.permute.xlu0 %3626  ;;  %v5897_v17 = vld [vmem:[#allocation28_spill] sm:$0xff] }
 0x458   :  { %2913 = vmatprep.mubr.f32.mxu0 %v5874_v38  ;;  %2990 = vmatprep.mubr.f32.mxu1 %v5874_v38  ;;  %v3028_v18 = vsel %vm1107_vm1, %v3022_v41, %v5236_v63  ;;  %v3030_v56 = vsel %vm1107_vm1, %v5199_v52, %v3022_v41  ;;  %v3029_v63 = vsel %vm1107_vm1, %v5186_v16, %v5146_v33  ;;  %v4049_v33 = vld [vmem:[%s5707_s2 + $0x48] sm:$0xff] }
 0x459   :  { %v3040_v25 = vmul.f32 %v5889_v54, %v3030_v56  ;;  %v3041_v28 = vmul.f32 %v5890_v29, %v3028_v18  ;;  %v3036_v0 = vmul.f32 %v5889_v54, %v3029_v63  ;;  %v3037_v16 = vmul.f32 %v5890_v29, %v3027_v3 }
 0x45a   :  { %v3445_v54 = vmul.f32 %v5899_v45, %v3438_v50 }
 0x45b   :  { %4050 = vmatmul.mubr.msk.f32.vlgmr.msra.gmra.mxu0 %vm167_vm11, %v4048_v61  ;;  %4052 = vmatmul.mubr.msk.f32.vlgmr.msra.gmra.mxu1 %vm167_vm11, %v4048_v61  ;;  %v5456_v52 = vpop.permute.xlu1 %3417  ;;  %v3623_v37 = vpop.permute.xlu0 %3622  ;;  %v5898_v61 = vld [vmem:[#allocation30_spill] sm:$0xff] }
 0x45c   :  { %2919 = vmatprep.mubr.f32.mxu0 %v5874_v38  ;;  %2996 = vmatprep.mubr.f32.mxu1 %v5874_v38  ;;  %v3641_v44 = vsel %vm1751_vm4, %v3623_v37, %v5475_v32 }
 0x45d   :  { %3080 = vmatprep.subr.mxu0 %v3040_v25  ;;  %3158 = vmatpush1.msra.mxu1 %v3041_v28  ;;  %v3437_v25 = vsel %vm1539_vm15, %v5456_v52, %v5410_v11 }
 0x45e   :  { %3081 = vmatpush1.msra.mxu0 %v3039_v39  ;;  %3159 = vmatprep.subr.mxu1 %v3038_v40 }
 0x45f   :  { %4051 = vmatmul.mubr.msk.f32.gmra.mxu0 %vm167_vm11, %v4049_v33  ;;  %4053 = vmatmul.mubr.msk.f32.gmra.mxu1 %vm167_vm11, %v4049_v33  ;;  %v3225_v13 = vpop.permute.xlu1 %3224  ;;  %v3635_v56 = vpop.permute.xlu0 %3634 }
 0x460   :  { %3082 = vmatprep.subr.mxu0 %v3036_v0  ;;  %3160 = vmatpush1.msra.mxu1 %v3037_v16  ;;  %v3231_v47 = vsel %vm1319_vm3, %v3225_v13, %v5327_v24  ;;  %v3233_v60 = vsel %vm1319_vm3, %v5271_v48, %v3225_v13  ;;  %v3232_v48 = vsel %vm1319_vm3, %v5329_v55, %v5168_v42  ;;  %v5901_v0 = vld [vmem:[#allocation32_spill] sm:$0xff] }
 0x461   :  { %3083 = vmatpush1.msra.mxu0 %v3035_v53  ;;  %3116 = vmatprep.mubr.f32.mxu0 %v5874_v38  ;;  %v3243_v2 = vmul.f32 %v5893_v15, %v3233_v60  ;;  %v3244_v12 = vmul.f32 %v5894_v14, %v3231_v47  ;;  %v3230_v24 = vsel %vm1319_vm3, %v5168_v42, %v5394_v30  ;;  %v4055_v42 = vld [vmem:[%s5707_s2 + $0x58] sm:$0xff] }
 0x462   :  { %3193 = vmatprep.mubr.f32.mxu1 %v5874_v38  ;;  %3360 = vmatprep.subr.mxu1 %v3245_v5  ;;  %v3239_v55 = vmul.f32 %v5893_v15, %v3232_v48  ;;  %v3240_v20 = vmul.f32 %v5894_v14, %v3230_v24  ;;  %v3448_v30 = vmul.f32 %v5896_v4, %v3440_v34  ;;  %v5902_v53 = vld [vmem:[#allocation34_spill] sm:$0xff] }
 0x463   :  { %4056 = vmatmul.mubr.msk.f32.vlgmr.msra.gmra.mxu0 %vm167_vm11, %v4054_v36  ;;  %4058 = vmatmul.mubr.msk.f32.vlgmr.msra.gmra.mxu1 %vm167_vm11, %v4054_v36  ;;  %v3430_v46 = vpop.permute.xlu1 %3429  ;;  %v3643_v28 = vsel %vm1751_vm4, %v3635_v56, %v3623_v37  ;;  %v4067_v36 = vld [vmem:[%s5707_s2 + $0x78] sm:$0xff] }
 0x464   :  { %3122 = vmatprep.mubr.f32.mxu0 %v5874_v38  ;;  %3199 = vmatprep.mubr.f32.mxu1 %v5874_v38  ;;  %v3439_v31 = vsel %vm1539_vm15, %v3430_v46, %v5456_v52  ;;  %v3651_v39 = vmul.f32 %v5900_v8, %v3643_v28 }
 0x465   :  { %3283 = vmatprep.subr.mxu0 %v3243_v2  ;;  %3361 = vmatpush1.msra.mxu1 %v3244_v12  ;;  %v3444_v29 = vmul.f32 %v5896_v4, %v3439_v31  ;;  %v4072_v12 = vld [vmem:[%s5707_s2 + $0x80] sm:$0xff] }
 0x466   :  { %3284 = vmatpush1.msra.mxu0 %v3242_v57  ;;  %3362 = vmatprep.subr.mxu1 %v3241_v43 }
 0x467   :  { %4057 = vmatmul.mubr.msk.f32.gmra.mxu0 %vm167_vm11, %v4055_v42  ;;  %4059 = vmatmul.mubr.msk.f32.gmra.mxu1 %vm167_vm11, %v4055_v42  ;;  %v3428_v10 = vpop.permute.xlu1 %3427 }
 0x468   :  { %3285 = vmatprep.subr.mxu0 %v3239_v55  ;;  %3363 = vmatpush1.msra.mxu1 %v3240_v20  ;;  %v3434_v1 = vsel %vm1539_vm15, %v3428_v10, %v5423_v21  ;;  %v3436_v6 = vsel %vm1539_vm15, %v5349_v9, %v3428_v10  ;;  %v3435_v9 = vsel %vm1539_vm15, %v5410_v11, %v5184_v7 }
 0x469   :  { %3286 = vmatpush1.msra.mxu0 %v3238_v26  ;;  %3319 = vmatprep.mubr.f32.mxu0 %v5874_v38  ;;  %v3446_v41 = vmul.f32 %v5897_v17, %v3436_v6  ;;  %v3447_v18 = vmul.f32 %v5898_v61, %v3434_v1  ;;  %v3433_v21 = vsel %vm1539_vm15, %v5184_v7, %v3430_v46  ;;  %v4061_v7 = vld [vmem:[%s5707_s2 + $0x68] sm:$0xff] }
 0x46a   :  { %3396 = vmatprep.mubr.f32.mxu1 %v5874_v38  ;;  %3563 = vmatprep.subr.mxu1 %v3448_v30  ;;  %v3442_v63 = vmul.f32 %v5897_v17, %v3435_v9  ;;  %v3443_v3 = vmul.f32 %v5898_v61, %v3433_v21  ;;  %v3441_v11 = vmul.f32 %v5899_v45, %v3437_v25 }
 0x46b   :  { %4062 = vmatmul.mubr.msk.f32.vlgmr.msra.gmra.mxu0 %vm167_vm11, %v4060_v59  ;;  %4064 = vmatmul.mubr.msk.f32.vlgmr.msra.gmra.mxu1 %vm167_vm11, %v4060_v59  ;;  %v3625_v51 = vpop.permute.xlu1 %3624 }
 0x46c   :  { %3325 = vmatprep.mubr.f32.mxu0 %v5874_v38  ;;  %3402 = vmatprep.mubr.f32.mxu1 %v5874_v38  ;;  %v3638_v13 = vsel %vm1751_vm4, %v3625_v51, %v5385_v62 }
 0x46d   :  { %3486 = vmatprep.subr.mxu0 %v3446_v41  ;;  %3564 = vmatpush1.msra.mxu1 %v3447_v18  ;;  %v3645_v22 = vmul.f32 %v5901_v0, %v3638_v13 }
 0x46e   :  { %3487 = vmatpush1.msra.mxu0 %v3445_v54  ;;  %3565 = vmatprep.subr.mxu1 %v3444_v29 }
 0x46f   :  { %4063 = vmatmul.mubr.msk.f32.gmra.mxu0 %vm167_vm11, %v4061_v7  ;;  %4065 = vmatmul.mubr.msk.f32.gmra.mxu1 %vm167_vm11, %v4061_v7  ;;  %v3631_v52 = vpop.permute.xlu1 %3630 }
 0x470   :  { %3488 = vmatprep.subr.mxu0 %v3442_v63  ;;  %3566 = vmatpush1.msra.mxu1 %v3443_v3  ;;  %v3637_v40 = vsel %vm1751_vm4, %v3631_v52, %v3635_v56  ;;  %v3639_v33 = vsel %vm1751_vm4, %v5475_v32, %v3631_v52  ;;  %v5903_v32 = vld [vmem:[#allocation33_spill] sm:$0xff] }
 0x471   :  { %3489 = vmatpush1.msra.mxu0 %v3441_v11  ;;  %3522 = vmatprep.mubr.f32.mxu0 %v5874_v38  ;;  %v3649_v16 = vmul.f32 %v5901_v0, %v3639_v33  ;;  %v3650_v49 = vmul.f32 %v5902_v53, %v3637_v40  ;;  %v3648_v5 = vmul.f32 %v5903_v32, %v3641_v44 }
 0x472   :  { %3599 = vmatprep.mubr.f32.mxu1 %v5874_v38  ;;  %3766 = vmatprep.subr.mxu1 %v3651_v39 }
 0x473   :  { %4068 = vmatmul.mubr.msk.f32.vlgmr.msra.gmra.mxu0 %vm167_vm11, %v4066_v35  ;;  %4070 = vmatmul.mubr.msk.f32.vlgmr.msra.gmra.mxu1 %vm167_vm11, %v4066_v35  ;;  %v3621_v19 = vpop.permute.xlu1 %3620 }
 0x474   :  { %3528 = vmatprep.mubr.f32.mxu0 %v5874_v38  ;;  %3605 = vmatprep.mubr.f32.mxu1 %v5874_v38  ;;  %v3640_v47 = vsel %vm1751_vm4, %v3621_v19, %v3625_v51 }
 0x475   :  { %3689 = vmatprep.subr.mxu0 %v3649_v16  ;;  %3767 = vmatpush1.msra.mxu1 %v3650_v49  ;;  %v3644_v60 = vmul.f32 %v5903_v32, %v3640_v47 }
 0x476   :  { %3690 = vmatpush1.msra.mxu0 %v3648_v5 }
 0x477   :  { %4069 = vmatmul.mubr.msk.f32.gmra.mxu0 %vm167_vm11, %v4067_v36  ;;  %4071 = vmatmul.mubr.msk.f32.gmra.mxu1 %vm167_vm11, %v4067_v36  ;;  %v3633_v15 = vpop.permute.xlu1 %3632 }
 0x478   :  { %3691 = vmatprep.subr.mxu0 %v3645_v22  ;;  %3725 = vmatprep.mubr.f32.mxu0 %v5874_v38  ;;  %v3636_v2 = vsel %vm1751_vm4, %v5385_v62, %v3633_v15  ;;  %v3642_v14 = vsel %vm1751_vm4, %v3633_v15, %v3621_v19 }
 0x479   :  { %3692 = vmatpush1.msra.mxu0 %v3644_v60  ;;  %v3646_v48 = vmul.f32 %v5902_v53, %v3636_v2  ;;  %v3647_v24 = vmul.f32 %v5900_v8, %v3642_v14  ;;  %3802 = vmatprep.mubr.f32.mxu1 %v5874_v38 }
 0x47b   :  { %4074 = vmatmul.mubr.msk.f32.vlgmr.msra.gmra.mxu0 %vm167_vm11, %v4072_v12  ;;  %3768 = vmatprep.subr.mxu1 %v3647_v24 }
 0x47c   :  { %3731 = vmatprep.mubr.f32.mxu0 %v5874_v38  ;;  %3769 = vmatpush1.msra.mxu1 %v3646_v48 }
 0x47d   :  { %4076 = vmatmul.mubr.msk.f32.vlgmr.msra.gmra.mxu1 %vm167_vm11, %v4072_v12 }
 0x47e   :  { %3808 = vmatprep.mubr.f32.mxu1 %v5874_v38 }
 0x47f   :  { %4075 = vmatmul.mubr.msk.f32.gmra.mxu0 %vm167_vm11, %v4073_v23 }
 0x481   :  { %4077 = vmatmul.mubr.msk.f32.gmra.mxu1 %vm167_vm11, %v4073_v23 }
 0x4f6   :  { %v2186_v62 = vpop.f32.mrf.mxu0 }
 0x4f7   :  { %v2263_v46 = vpop.f32.mrf.mxu1 }
 0x4f8   :  { %v2188_v58 = vpop.f32.mrf.mxu0 }
 0x4f9   :  { %v2265_v57 = vpop.f32.mrf.mxu1 }
 0x4fa   :  { %v2192_v27 = vpop.f32.mrf.mxu0 }
 0x4fb   :  { %v2269_v43 = vpop.f32.mrf.mxu1 }
 0x4fc   :  { %v2194_v37 = vpop.f32.mrf.mxu0 }
 0x4fd   :  { %v5634_v42 = vpop.f32.mrf.mxu1 }
 0x4fe   :  { %5904 = vst [vmem:[#allocation36_spill] sm:$0xff] %v5634_v42 }
 0x500   :  { %v2346_v34 = vpop.f32.mrf.mxu0 }
 0x501   :  { %v2423_v55 = vpop.f32.mrf.mxu1  ;;  %v2347_v47 = vadd.f32 %v2346_v34, %v2186_v62 }
 0x502   :  { %v2348_v20 = vpop.f32.mrf.mxu0  ;;  %v2424_v60 = vadd.f32 %v2423_v55, %v2263_v46 }
 0x503   :  { %v2425_v26 = vpop.f32.mrf.mxu1  ;;  %v2349_v22 = vadd.f32 %v2348_v20, %v2188_v58 }
 0x504   :  { %v2352_v50 = vpop.f32.mrf.mxu0  ;;  %v2426_v14 = vadd.f32 %v2425_v26, %v2265_v57 }
 0x505   :  { %v2429_v10 = vpop.f32.mrf.mxu1  ;;  %v2353_v23 = vadd.f32 %v2352_v50, %v2192_v27 }
 0x506   :  { %v2354_v38 = vpop.f32.mrf.mxu0  ;;  %v2430_v42 = vadd.f32 %v2429_v10, %v2269_v43 }
 0x507   :  { %v2431_v4 = vpop.f32.mrf.mxu1 }
 0x509   :  { %v2541_v30 = vpop.f32.mrf.mxu0  ;;  %v2618_v59 = vpop.f32.mrf.mxu1 }
 0x50a   :  { %v2629_v12 = vadd.f32 %v2541_v30, %v2347_v47  ;;  %v2631_v48 = vadd.f32 %v2618_v59, %v2424_v60 }
 0x50b   :  { %v2543_v1 = vpop.f32.mrf.mxu0  ;;  %v2620_v6 = vpop.f32.mrf.mxu1 }
 0x50c   :  { %v2630_v24 = vadd.f32 %v2543_v1, %v2349_v22  ;;  %v2632_v46 = vadd.f32 %v2620_v6, %v2426_v14 }
 0x50d   :  { %v2547_v31 = vpop.f32.mrf.mxu0  ;;  %v2624_v17 = vpop.f32.mrf.mxu1 }
 0x50e   :  { %v2633_v57 = vadd.f32 %v2547_v31, %v2353_v23  ;;  %v2635_v30 = vadd.f32 %v2624_v17, %v2430_v42 }
 0x50f   :  { %v2549_v41 = vpop.f32.mrf.mxu0  ;;  %v2626_v61 = vpop.f32.mrf.mxu1 }
 0x511   :  { %v2744_v18 = vpop.f32.mrf.mxu0  ;;  %v2821_v56 = vpop.f32.mrf.mxu1 }
 0x512   :  { %v2832_v55 = vadd.f32 %v2744_v18, %v2629_v12  ;;  %v2834_v20 = vadd.f32 %v2821_v56, %v2631_v48 }
 0x513   :  { %v2746_v9 = vpop.f32.mrf.mxu0  ;;  %v2823_v21 = vpop.f32.mrf.mxu1 }
 0x514   :  { %v2833_v58 = vadd.f32 %v2746_v9, %v2630_v24  ;;  %v2835_v1 = vadd.f32 %v2823_v21, %v2632_v46 }
 0x517   :  { %v2750_v51 = vpop.f32.mrf.mxu0  ;;  %v2827_v45 = vpop.f32.mrf.mxu1 }
 0x518   :  { %v2836_v43 = vadd.f32 %v2750_v51, %v2633_v57 }
 0x519   :  { %v2752_v54 = vpop.f32.mrf.mxu0  ;;  %v2829_v25 = vpop.f32.mrf.mxu1 }
 0x51b   :  { %v2915_v29 = vpop.f32.mrf.mxu0  ;;  %v2992_v7 = vpop.f32.mrf.mxu1 }
 0x51c   :  { %v3003_v22 = vadd.f32 %v2915_v29, %v2832_v55  ;;  %v3005_v27 = vadd.f32 %v2992_v7, %v2834_v20 }
 0x51d   :  { %v2917_v28 = vpop.f32.mrf.mxu0  ;;  %v2994_v63 = vpop.f32.mrf.mxu1 }
 0x51e   :  { %v3004_v50 = vadd.f32 %v2917_v28, %v2833_v58  ;;  %v3006_v18 = vadd.f32 %v2994_v63, %v2835_v1 }
 0x51f   :  { %v2921_v3 = vpop.f32.mrf.mxu0  ;;  %v2998_v11 = vpop.f32.mrf.mxu1 }
 0x520   :  { %v3007_v31 = vadd.f32 %v2921_v3, %v2836_v43 }
 0x521   :  { %v2923_v52 = vpop.f32.mrf.mxu0  ;;  %v3000_v8 = vpop.f32.mrf.mxu1 }
 0x523   :  { %v3118_v39 = vpop.f32.mrf.mxu0  ;;  %v3195_v35 = vpop.f32.mrf.mxu1 }
 0x524   :  { %v3206_v56 = vadd.f32 %v3118_v39, %v3003_v22  ;;  %v3208_v9 = vadd.f32 %v3195_v35, %v3005_v27 }
 0x525   :  { %v3120_v40 = vpop.f32.mrf.mxu0  ;;  %v3197_v33 = vpop.f32.mrf.mxu1 }
 0x526   :  { %v3207_v12 = vadd.f32 %v3120_v40, %v3004_v50 }
 0x527   :  { %v3124_v44 = vpop.f32.mrf.mxu0  ;;  %v3201_v0 = vpop.f32.mrf.mxu1 }
 0x529   :  { %v3126_v16 = vpop.f32.mrf.mxu0  ;;  %v5636_v53 = vpop.f32.mrf.mxu1 }
 0x52a   :  { %5905 = vst [vmem:[#allocation37_spill] sm:$0xff] %v5636_v53  ;;  %v2355_v53 = vadd.f32 %v2354_v38, %v2194_v37  ;;  %v2838_v37 = vadd.f32 %v2827_v45, %v2635_v30 }
 0x52b   :  { %v3321_v49 = vpop.f32.mrf.mxu0  ;;  %v3398_v13 = vpop.f32.mrf.mxu1 }
 0x52c   :  { %v2634_v47 = vadd.f32 %v2549_v41, %v2355_v53  ;;  %v3009_v42 = vadd.f32 %v2998_v11, %v2838_v37  ;;  %v3209_v53 = vadd.f32 %v3197_v33, %v3006_v18  ;;  %v3409_v21 = vadd.f32 %v3321_v49, %v3206_v56 }
 0x52d   :  { %v3323_v19 = vpop.f32.mrf.mxu0  ;;  %v3400_v32 = vpop.f32.mrf.mxu1  ;;  %v3411_v29 = vadd.f32 %v3398_v13, %v3208_v9 }
 0x52e   :  { %v2837_v38 = vadd.f32 %v2752_v54, %v2634_v47  ;;  %v3410_v7 = vadd.f32 %v3323_v19, %v3207_v12  ;;  %v3212_v51 = vadd.f32 %v3201_v0, %v3009_v42  ;;  %v3412_v48 = vadd.f32 %v3400_v32, %v3209_v53 }
 0x52f   :  { %v3327_v5 = vpop.f32.mrf.mxu0  ;;  %v3404_v36 = vpop.f32.mrf.mxu1 }
 0x530   :  { %v3008_v17 = vadd.f32 %v2923_v52, %v2837_v38  ;;  %v3415_v11 = vadd.f32 %v3404_v36, %v3212_v51 }
 0x531   :  { %v3329_v15 = vpop.f32.mrf.mxu0  ;;  %v5638_v2 = vpop.f32.mrf.mxu1  ;;  %v5908_v40 = vld [vmem:[#allocation37_spill] sm:$0xff] }
 0x532   :  { %5906 = vst [vmem:[#allocation38_spill] sm:$0xff] %v5638_v2  ;;  %v5907_v2 = vld [vmem:[#allocation36_spill] sm:$0xff]  ;;  %v3211_v45 = vadd.f32 %v3126_v16, %v3008_v17 }
 0x533   :  { %v3524_v34 = vpop.f32.mrf.mxu0  ;;  %v3601_v62 = vpop.f32.mrf.mxu1  ;;  %v2432_v26 = vadd.f32 %v2431_v4, %v5907_v2 }
 0x534   :  { %v3612_v63 = vadd.f32 %v3524_v34, %v3409_v21  ;;  %v3614_v39 = vadd.f32 %v3601_v62, %v3411_v29  ;;  %v3414_v52 = vadd.f32 %v3329_v15, %v3211_v45 }
 0x535   :  { %v3526_v59 = vpop.f32.mrf.mxu0  ;;  %v3603_v60 = vpop.f32.mrf.mxu1  ;;  %v2636_v10 = vadd.f32 %v2626_v61, %v2432_v26  ;;  %v3210_v61 = vadd.f32 %v3124_v44, %v3007_v31 }
 0x536   :  { %v3613_v35 = vadd.f32 %v3526_v59, %v3410_v7  ;;  %v3615_v49 = vadd.f32 %v3603_v60, %v3412_v48 }
 0x537   :  { %v3530_v6 = vpop.f32.mrf.mxu0  ;;  %v3607_v14 = vpop.f32.mrf.mxu1  ;;  %v2839_v4 = vadd.f32 %v2829_v25, %v2636_v10  ;;  %v3413_v3 = vadd.f32 %v3327_v5, %v3210_v61 }
 0x538   :  { %v3618_v32 = vadd.f32 %v3607_v14, %v3415_v11 }
 0x539   :  { %v3532_v41 = vpop.f32.mrf.mxu0  ;;  %v3010_v28 = vadd.f32 %v3000_v8, %v2839_v4  ;;  %v3609_v54 = vpop.f32.mrf.mxu1  ;;  %v5909_v44 = vld [vmem:[#allocation38_spill] sm:$0xff]  ;;  %v3616_v16 = vadd.f32 %v3530_v6, %v3413_v3 }
 0x53a   :  { %v3617_v34 = vadd.f32 %v3532_v41, %v3414_v52  ;;  %v3864_v52 = vld [vmem:[%s5708_s5 + $0x8] sm:$0xff] }
 0x53b   :  { %v3727_v2 = vpop.f32.mrf.mxu0  ;;  %v3213_v25 = vadd.f32 %v5908_v40, %v3010_v28 }
 0x53c   :  { %v3815_v13 = vadd.f32 %v3727_v2, %v3612_v63 }
 0x53d   :  { %v3729_v24 = vpop.f32.mrf.mxu0  ;;  %v3804_v33 = vpop.f32.mrf.mxu1  ;;  %v3416_v0 = vadd.f32 %v5909_v44, %v3213_v25  ;;  %v3863_v25 = vld [vmem:[%s5708_s5] sm:$0xff] }
 0x53e   :  { %v3816_v19 = vadd.f32 %v3729_v24, %v3613_v35  ;;  %v3817_v8 = vadd.f32 %v3804_v33, %v3614_v39  ;;  %v3889_v33 = vld [vmem:[%s5709_s6] sm:$0xff] }
 0x53f   :  { %v3733_v23 = vpop.f32.mrf.mxu0  ;;  %v3806_v46 = vpop.f32.mrf.mxu1  ;;  %v3619_v20 = vadd.f32 %v3609_v54, %v3416_v0 }
 0x540   :  { %v3823_v62 = vadd.f32 %v3816_v19, %v3815_v13  ;;  %v3818_v55 = vadd.f32 %v3806_v46, %v3615_v49  ;;  %v3819_v36 = vadd.f32 %v3733_v23, %v3616_v16 }
 0x541   :  { %v3735_v58 = vpop.f32.mrf.mxu0  ;;  %v3810_v5 = vpop.f32.mrf.mxu1 }
 0x542   :  { %v3824_v15 = vadd.f32 %v3823_v62, %v3817_v8  ;;  %v3820_v26 = vadd.f32 %v3735_v58, %v3617_v34  ;;  %v3821_v57 = vadd.f32 %v3810_v5, %v3618_v32 }
 0x543   :  { %v3812_v30 = vpop.f32.mrf.mxu1 }
 0x544   :  { %v3828_v47 = vadd.f32 %v3820_v26, %v3819_v36  ;;  %v3825_v59 = vadd.f32 %v3824_v15, %v3818_v55  ;;  %v3822_v60 = vadd.f32 %v3812_v30, %v3619_v20  ;;  %v4102_v15 = vld [vmem:[%s5703_s0] sm:$0xff] }
 0x546   :  { %v3829_v1 = vadd.f32 %v3828_v47, %v3821_v57  ;;  %3826 = vadd.xlane.f32.xlu0 %v3825_v59  ;;  %v4104_v47 = vld [vmem:[%s5703_s0 + $0x20] sm:$0xff] }
 0x548   :  { %v3830_v22 = vadd.f32 %v3829_v1, %v3822_v60 }
 0x54a   :  { %3831 = vadd.xlane.f32.xlu1 %v3830_v22 }
 0x5cf   :  { %v3827_v27 = vpop.xlane.xlu0 %3826 }
 0x5d0   :  { %v3833_v50 = vmul.f32 0.001953125, %v3827_v27 }
 0x5d2   :  { %v3835_v10 = vsub.f32 %v3815_v13, %v3833_v50  ;;  %v3836_v43 = vsub.f32 %v3816_v19, %v3833_v50  ;;  %v3837_v37 = vsub.f32 %v3817_v8, %v3833_v50  ;;  %v3838_v6 = vsub.f32 %v3818_v55, %v3833_v50  ;;  %v3890_v13 = vld [vmem:[%s5709_s6 + $0x8] sm:$0xff] }
 0x5d3   :  { %v3832_v38 = vpop.xlane.xlu1 %3831 }
 0x5d4   :  { %v3834_v14 = vmul.f32 0.001953125, %v3832_v38  ;;  %v3843_v18 = vmul.f32 %v3835_v10, %v3835_v10  ;;  %v3844_v56 = vmul.f32 %v3836_v43, %v3836_v43  ;;  %v3845_v9 = vmul.f32 %v3837_v37, %v3837_v37 }
 0x5d5   :  { %v3846_v17 = vmul.f32 %v3838_v6, %v3838_v6 }
 0x5d6   :  { %v3839_v12 = vsub.f32 %v3819_v36, %v3834_v14  ;;  %v3840_v4 = vsub.f32 %v3820_v26, %v3834_v14  ;;  %v3841_v31 = vsub.f32 %v3821_v57, %v3834_v14  ;;  %v3851_v42 = vadd.f32 %v3844_v56, %v3843_v18  ;;  %v4103_v57 = vld [vmem:[%s5703_s0 + $0x8] sm:$0xff]  ;;  %v4106_v18 = vld [vmem:[%s5703_s0 + $0x10] sm:$0xff] }
 0x5d7   :  { %v3842_v53 = vsub.f32 %v3822_v60, %v3834_v14  ;;  %v4105_v60 = vld [vmem:[%s5703_s0 + $0x28] sm:$0xff] }
 0x5d8   :  { %v3852_v41 = vadd.f32 %v3851_v42, %v3845_v9  ;;  %v3847_v21 = vmul.f32 %v3839_v12, %v3839_v12  ;;  %v3848_v29 = vmul.f32 %v3840_v4, %v3840_v4  ;;  %v3849_v28 = vmul.f32 %v3841_v31, %v3841_v31  ;;  %v4107_v9 = vld [vmem:[%s5703_s0 + $0x18] sm:$0xff] }
 0x5d9   :  { %v3850_v51 = vmul.f32 %v3842_v53, %v3842_v53  ;;  %v4109_v42 = vld [vmem:[%s5703_s0 + $0x38] sm:$0xff] }
 0x5da   :  { %v3853_v7 = vadd.f32 %v3852_v41, %v3846_v17  ;;  %v3856_v61 = vadd.f32 %v3848_v29, %v3847_v21 }
 0x5dc   :  { %3854 = vadd.xlane.f32.xlu0 %v3853_v7  ;;  %v3857_v45 = vadd.f32 %v3856_v61, %v3849_v28 }
 0x5de   :  { %v3858_v54 = vadd.f32 %v3857_v45, %v3850_v51 }
 0x5e0   :  { %3859 = vadd.xlane.f32.xlu0 %v3858_v54 }
 0x665   :  { %v3855_v2 = vpop.xlane.xlu0 %3854 }
 0x666   :  { %v3861_v48 = vmul.f32 0.001953125, %v3855_v2 }
 0x668   :  { %v3865_v63 = vadd.f32 1e-05, %v3861_v48 }
 0x669   :  { %v3860_v39 = vpop.xlane.xlu0 %3859 }
 0x66a   :  { %4098 = vrsqrt.f32 %v3865_v63  ;;  %v3862_v35 = vmul.f32 0.001953125, %v3860_v39 }
 0x66c   :  { %v3866_v40 = vadd.f32 1e-05, %v3862_v35 }
 0x66e   :  { %4100 = vrsqrt.f32 %v3866_v40 }
 0x677   :  { %v4099_v3 = vpop.eup %4098 }
 0x678   :  { %v3869_v11 = vmul.f32 %v4099_v3, %v3863_v25 }
 0x67a   :  { %3873 = vperm.xlu1 %4093, %v3869_v11  }
 0x67b   :  { %v4101_v24 = vpop.eup %4100 }
 0x67c   :  { %v3870_v49 = vmul.f32 %v4101_v24, %v3864_v52 }
 0x67e   :  { %3893 = vperm.xlu1 %4093, %v3889_v33   ;;  %3878 = vperm.xlu0 %4092, %v3870_v49  }
 0x682   :  { %3898 = vperm.xlu1 %4093, %v3890_v13  }
 0x6f5   :  { %v3874_v19 = vpop.permute.xlu1 %3873 }
 0x6f6   :  { %v3881_v8 = vmul.f32 %v3874_v19, %v3835_v10  ;;  %v3882_v44 = vmul.f32 %v3874_v19, %v3836_v43  ;;  %v3883_v0 = vmul.f32 %v3874_v19, %v3837_v37  ;;  %v3884_v16 = vmul.f32 %v3874_v19, %v3838_v6 }
 0x6f9   :  { %v3879_v23 = vpop.permute.xlu0 %3878  ;;  %v3894_v46 = vpop.permute.xlu1 %3893 }
 0x6fa   :  { %v3901_v32 = vadd.f32 %v3894_v46, %v3881_v8  ;;  %v3902_v34 = vadd.f32 %v3894_v46, %v3882_v44  ;;  %v3903_v62 = vadd.f32 %v3894_v46, %v3883_v0  ;;  %v3904_v55 = vadd.f32 %v3894_v46, %v3884_v16 }
 0x6fb   :  { %v3885_v20 = vmul.f32 %v3879_v23, %v3839_v12  ;;  %v3886_v58 = vmul.f32 %v3879_v23, %v3840_v4  ;;  %v3887_v5 = vmul.f32 %v3879_v23, %v3841_v31  ;;  %v3888_v36 = vmul.f32 %v3879_v23, %v3842_v53  ;;  %v4108_v4 = vld [vmem:[%s5703_s0 + $0x30] sm:$0xff] }
 0x6fc   :  { %v3909_v26 = vadd.f32 %v4102_v15, %v3901_v32  ;;  %v3910_v30 = vadd.f32 %v4103_v57, %v3902_v34  ;;  %v3911_v59 = vadd.f32 %v4104_v47, %v3903_v62  ;;  %v3912_v1 = vadd.f32 %v4105_v60, %v3904_v55 }
 0x6fd   :  { %v3899_v22 = vpop.permute.xlu1 %3898 }
 0x6fe   :  { %v3905_v27 = vadd.f32 %v3899_v22, %v3885_v20  ;;  %v3906_v50 = vadd.f32 %v3899_v22, %v3886_v58  ;;  %v3907_v10 = vadd.f32 %v3899_v22, %v3887_v5  ;;  %v3908_v43 = vadd.f32 %v3899_v22, %v3888_v36 }
 0x6ff   :  { %v3917_v37 = vmax.f32 %v3909_v26, 0.0  ;;  %v3918_v38 = vmax.f32 %v3910_v30, 0.0  ;;  %v3919_v6 = vmax.f32 %v3911_v59, 0.0  ;;  %v3920_v14 = vmax.f32 %v3912_v1, 0.0 }
 0x700   :  { %v3913_v56 = vadd.f32 %v4106_v18, %v3905_v27  ;;  %v3914_v12 = vadd.f32 %v4107_v9, %v3906_v50  ;;  %v3915_v31 = vadd.f32 %v4108_v4, %v3907_v10  ;;  %v3916_v17 = vadd.f32 %v4109_v42, %v3908_v43 }
 0x701   :  { %3925 = vst [vmem:[%s5710_s7] sm:$0xff] %v3917_v37  ;;  %3926 = vst [vmem:[%s5710_s7 + $0x8] sm:$0xff] %v3918_v38 }
 0x702   :  { %4078 = vst [vmem:[%s5710_s7 + $0x20] sm:$0xff] %v3919_v6  ;;  %4079 = vst [vmem:[%s5710_s7 + $0x28] sm:$0xff] %v3920_v14  ;;  %v3921_v41 = vmax.f32 %v3913_v56, 0.0  ;;  %v3922_v53 = vmax.f32 %v3914_v12, 0.0  ;;  %v3923_v21 = vmax.f32 %v3915_v31, 0.0  ;;  %v3924_v29 = vmax.f32 %v3916_v17, 0.0 }
 0x704   :  { %3927 = vst [vmem:[%s5710_s7 + $0x10] sm:$0xff] %v3921_v41  ;;  %3928 = vst [vmem:[%s5710_s7 + $0x18] sm:$0xff] %v3922_v53 }
 0x705   :  { %4080 = vst [vmem:[%s5710_s7 + $0x30] sm:$0xff] %v3923_v21  ;;  %4081 = vst [vmem:[%s5710_s7 + $0x38] sm:$0xff] %v3924_v29 }

</bundles_post_ra>
